<compile_context>
chip_gen: v5e
topology: v5e:2x2
jax: 0.10.0
libtpu: 0.0.40
codegen_flags: <defaults>
</compile_context>

<pallas_src>
import functools

import jax
import jax.numpy as jnp
from jax.experimental import pallas as pl
from jax.experimental.pallas import tpu as pltpu


def _encoder_gru_kernel(x_ref, h0_ref, wih_ref, whh_ref, bih_ref, bhh_ref,
                        out_ref, hlast_ref, *, seq_len):
    """Whole-sequence GRU in one invocation.

    x_ref   : (S*B, H)  time-major flattened embeddings (rows = t*B + b)
    h0_ref  : (B, H)    initial hidden state
    wih_ref : (3, H, H) gate-major input weights  [r, z, n]
    whh_ref : (3, H, H) gate-major hidden weights [r, z, n]
    bih_ref : (3, 1, H) input biases
    bhh_ref : (3, 1, H) hidden biases
    out_ref : (B, S, H) batch-first per-step outputs
    hlast_ref: (B, H)   final hidden state
    """
    B, H = h0_ref.shape

    xf = x_ref[...].astype(jnp.float32)                        # (S*B, H)

    # ---- Off the serial path: input projections for ALL timesteps at once. ----
    # PyTorch nn.GRU gate order [r, z, n]:
    #   r = sigmoid(W_ir x + b_ir + W_hr h + b_hr)
    #   z = sigmoid(W_iz x + b_iz + W_hz h + b_hz)
    #   n = tanh   (W_in x + b_in + r * (W_hn h + b_hn))
    #   h = (1 - z) * n + z * h_prev
    # b_hr / b_hz can be folded into the precomputed pre-activations; b_hn must
    # stay inside the r * (...) term.
    gx_r = (jnp.dot(xf, wih_ref[0], preferred_element_type=jnp.float32)
            + bih_ref[0] + bhh_ref[0])                         # (S*B, H)
    gx_z = (jnp.dot(xf, wih_ref[1], preferred_element_type=jnp.float32)
            + bih_ref[1] + bhh_ref[1])
    gx_n = (jnp.dot(xf, wih_ref[2], preferred_element_type=jnp.float32)
            + bih_ref[2])
    b_hn = bhh_ref[2]                                          # (1, H)

    w_hr = whh_ref[0]                                          # (H, H), hoisted loads
    w_hz = whh_ref[1]
    w_hn = whh_ref[2]

    # ---- Serial recurrence: fully unrolled, only h @ W_hh per step. ----
    h = h0_ref[...].astype(jnp.float32)                        # (B, H)
    for t in range(seq_len):
        lo = t * B                                             # static row offset
        gh_r = jnp.dot(h, w_hr, preferred_element_type=jnp.float32)
        gh_z = jnp.dot(h, w_hz, preferred_element_type=jnp.float32)
        gh_n = jnp.dot(h, w_hn, preferred_element_type=jnp.float32) + b_hn
        r = jax.nn.sigmoid(gx_r[lo:lo + B] + gh_r)
        z = jax.nn.sigmoid(gx_z[lo:lo + B] + gh_z)
        n = jnp.tanh(gx_n[lo:lo + B] + r * gh_n)
        h = n + z * (h - n)                                    # == (1-z)*n + z*h_prev
        out_ref[:, t:t + 1, :] = h[:, None, :].astype(out_ref.dtype)

    hlast_ref[...] = h.astype(hlast_ref.dtype)


def encoder_gru_pallas(x_flat, h0, w_ih_g, w_hh_g, b_ih_g, b_hh_g, seq_len):
    """x_flat: (S*B, H) time-major flattened embeddings; h0: (B, H).

    Returns (output (B, S, H), h_last (B, H)).
    """
    B, H = h0.shape
    S = seq_len
    assert x_flat.shape == (S * B, H)

    kernel = functools.partial(_encoder_gru_kernel, seq_len=S)

    grid_spec = pltpu.PrefetchScalarGridSpec(
        num_scalar_prefetch=0,
        grid=(1,),                                   # single invocation, all resident
        in_specs=[
            pl.BlockSpec((S * B, H), lambda i: (0, 0)),      # x slab (resident in VMEM)
            pl.BlockSpec((B, H), lambda i: (0, 0)),          # h0
            pl.BlockSpec((3, H, H), lambda i: (0, 0, 0)),    # W_ih (gate-major)
            pl.BlockSpec((3, H, H), lambda i: (0, 0, 0)),    # W_hh (gate-major)
            pl.BlockSpec((3, 1, H), lambda i: (0, 0, 0)),    # b_ih
            pl.BlockSpec((3, 1, H), lambda i: (0, 0, 0)),    # b_hh
        ],
        out_specs=[
            pl.BlockSpec((B, S, H), lambda i: (0, 0, 0)),    # batch-first output
            pl.BlockSpec((B, H), lambda i: (0, 0)),          # final hidden
        ],
    )
    return pl.pallas_call(
        kernel,
        out_shape=(
            jax.ShapeDtypeStruct((B, S, H), jnp.float32),
            jax.ShapeDtypeStruct((B, H), jnp.float32),
        ),
        grid_spec=grid_spec,
        compiler_params=pltpu.CompilerParams(
            # The recurrence is inherently serial; the single grid step carries
            # state.  For large batches (v7x, 2 TCs) one would add a batch-block
            # axis marked "parallel" here.
            dimension_semantics=("arbitrary",)),
    )(x_flat, h0, w_ih_g, w_hh_g, b_ih_g, b_hh_g)


def init_encoder_params(key, input_size, hidden_size):
    """Deterministic synthetic init mirroring nn.Embedding + nn.GRU shapes,
    with GRU weights stored gate-major: w[g] == PyTorch weight_*_l0[g*H:(g+1)*H, :].T."""
    k_emb, k_wih, k_whh, k_bih, k_bhh = jax.random.split(key, 5)
    bound = 1.0 / jnp.sqrt(float(hidden_size))
    return {
        # nn.Embedding(input_size, hidden_size): N(0, 1)
        "embedding": jax.random.normal(k_emb, (input_size, hidden_size), jnp.float32),
        # nn.GRU weights: U(-1/sqrt(H), 1/sqrt(H)), gate order [r, z, n]
        "w_ih_g": jax.random.uniform(k_wih, (3, hidden_size, hidden_size),
                                     jnp.float32, -bound, bound),
        "w_hh_g": jax.random.uniform(k_whh, (3, hidden_size, hidden_size),
                                     jnp.float32, -bound, bound),
        "b_ih_g": jax.random.uniform(k_bih, (3, 1, hidden_size),
                                     jnp.float32, -bound, bound),
        "b_hh_g": jax.random.uniform(k_bhh, (3, 1, hidden_size),
                                     jnp.float32, -bound, bound),
    }


@jax.jit
def encoder_rnn_forward(params, tokens, hidden):
    """tokens: (B, S) int32; hidden: (1, B, H).  Returns (output (B,S,H), hidden (1,B,H))."""
    B, S = tokens.shape
    # Embedding lookup is gather glue.  Gathering with transposed, flattened token
    # ids yields the time-major (S*B, H) slab directly -- no activation transpose.
    x_flat = jnp.take(params["embedding"], tokens.T.reshape(-1), axis=0)
    output, h_last = encoder_gru_pallas(
        x_flat, hidden[0], params["w_ih_g"], params["w_hh_g"],
        params["b_ih_g"], params["b_hh_g"], seq_len=S)
    return output, h_last[None, :, :]                          # (B,S,H), (1,B,H)


def _reference_forward(params, tokens, hidden):
    """Pure-JAX reference of PyTorch Embedding + GRU forward (gate order r,z,n)."""
    emb = jnp.take(params["embedding"], tokens, axis=0)        # (B, S, H)
    wih, whh = params["w_ih_g"], params["w_hh_g"]
    bih, bhh = params["b_ih_g"], params["b_hh_g"]

    def step(h, x_t):
        r = jax.nn.sigmoid(x_t @ wih[0] + bih[0] + h @ whh[0] + bhh[0])
        z = jax.nn.sigmoid(x_t @ wih[1] + bih[1] + h @ whh[1] + bhh[1])
        n = jnp.tanh(x_t @ wih[2] + bih[2] + r * (h @ whh[2] + bhh[2]))
        h_new = (1.0 - z) * n + z * h
        return h_new, h_new

    h_last, out_tm = jax.lax.scan(step, hidden[0], jnp.transpose(emb, (1, 0, 2)))
    return jnp.transpose(out_tm, (1, 0, 2)), h_last[None, :, :]


if __name__ == "__main__":
    VOCAB = 16      # input_size
    HIDDEN = 32     # hidden_size
    BATCH = 2
    SEQ = 8

    key = jax.random.PRNGKey(0)
    k_params, k_tok = jax.random.split(key)
    params = init_encoder_params(k_params, VOCAB, HIDDEN)

    tokens = jax.random.randint(k_tok, (BATCH, SEQ), 0, VOCAB, dtype=jnp.int32)
    hidden0 = jnp.zeros((1, BATCH, HIDDEN), jnp.float32)   # EncoderRNN.initHidden

    output, hidden = encoder_rnn_forward(params, tokens, hidden0)
    jax.block_until_ready((output, hidden))

    ref_out, ref_hid = _reference_forward(params, tokens, hidden0)
    assert output.shape == (BATCH, SEQ, HIDDEN)
    assert hidden.shape == (1, BATCH, HIDDEN)
    assert jnp.allclose(output, ref_out, rtol=1e-5, atol=1e-5)
    assert jnp.allclose(hidden, ref_hid, rtol=1e-5, atol=1e-5)

    print("KERNEL_OK")
</pallas_src>

<mosaic_0001>
module attributes {stable_mosaic.version = 11 : i64} {
  func.func @_encoder_gru_kernel(%arg0: i32, %arg1: memref<16x32xf32, #tpu.memory_space<vmem>>, %arg2: memref<2x32xf32, #tpu.memory_space<vmem>>, %arg3: memref<3x32x32xf32, #tpu.memory_space<vmem>>, %arg4: memref<3x32x32xf32, #tpu.memory_space<vmem>>, %arg5: memref<3x1x32xf32, #tpu.memory_space<vmem>>, %arg6: memref<3x1x32xf32, #tpu.memory_space<vmem>>, %arg7: memref<2x8x32xf32, #tpu.memory_space<vmem>>, %arg8: memref<2x32xf32, #tpu.memory_space<vmem>>) attributes {dimension_semantics = [#tpu.dimension_semantics<arbitrary>], iteration_bounds = array<i64: 1>, scalar_prefetch = 0 : i64, scratch_operands = 0 : i64, tpu.core_type = #tpu.core_type<tc>, window_params = [{pipeline_mode = #tpu.pipeline_mode<synchronous>, transform_indices = @transform_0, window_bounds = array<i64: 16, 32>}, {pipeline_mode = #tpu.pipeline_mode<synchronous>, transform_indices = @transform_1, window_bounds = array<i64: 2, 32>}, {pipeline_mode = #tpu.pipeline_mode<synchronous>, transform_indices = @transform_2, window_bounds = array<i64: 3, 32, 32>}, {pipeline_mode = #tpu.pipeline_mode<synchronous>, transform_indices = @transform_3, window_bounds = array<i64: 3, 32, 32>}, {pipeline_mode = #tpu.pipeline_mode<synchronous>, transform_indices = @transform_4, window_bounds = array<i64: 3, 1, 32>}, {pipeline_mode = #tpu.pipeline_mode<synchronous>, transform_indices = @transform_5, window_bounds = array<i64: 3, 1, 32>}, {pipeline_mode = #tpu.pipeline_mode<synchronous>, transform_indices = @transform_6, window_bounds = array<i64: 2, 8, 32>}, {pipeline_mode = #tpu.pipeline_mode<synchronous>, transform_indices = @transform_7, window_bounds = array<i64: 2, 32>}]} {
    %c0 = arith.constant 0 : index
    %c0_0 = arith.constant 0 : index
    %0 = vector.load %arg1[%c0, %c0_0] : memref<16x32xf32, #tpu.memory_space<vmem>>, vector<16x32xf32>
    %c0_1 = arith.constant 0 : index
    %c0_2 = arith.constant 0 : index
    %c0_3 = arith.constant 0 : index
    %1 = vector.load %arg3[%c0_1, %c0_2, %c0_3] : memref<3x32x32xf32, #tpu.memory_space<vmem>>, vector<1x32x32xf32>
    %2 = vector.shape_cast %1 : vector<1x32x32xf32> to vector<32x32xf32>
    %cst = arith.constant dense<0.000000e+00> : vector<16x32xf32>
    %3 = tpu.matmul %0, %2, %cst {dimension_numbers = #tpu.dot_dimension_numbers<[1], [0], [0], [1], [0, 0, 1, 1], [], []>} : vector<16x32xf32>, vector<32x32xf32>, vector<16x32xf32> -> vector<16x32xf32>
    %c0_4 = arith.constant 0 : index
    %c0_5 = arith.constant 0 : index
    %c0_6 = arith.constant 0 : index
    %4 = vector.load %arg5[%c0_4, %c0_5, %c0_6] : memref<3x1x32xf32, #tpu.memory_space<vmem>>, vector<1x1x32xf32>
    %5 = vector.shape_cast %4 : vector<1x1x32xf32> to vector<1x32xf32>
    %6 = vector.broadcast %5 : vector<1x32xf32> to vector<16x32xf32>
    %7 = arith.addf %3, %6 : vector<16x32xf32>
    %c0_7 = arith.constant 0 : index
    %c0_8 = arith.constant 0 : index
    %c0_9 = arith.constant 0 : index
    %8 = vector.load %arg6[%c0_7, %c0_8, %c0_9] : memref<3x1x32xf32, #tpu.memory_space<vmem>>, vector<1x1x32xf32>
    %9 = vector.shape_cast %8 : vector<1x1x32xf32> to vector<1x32xf32>
    %10 = vector.broadcast %9 : vector<1x32xf32> to vector<16x32xf32>
    %11 = arith.addf %7, %10 : vector<16x32xf32>
    %c1 = arith.constant 1 : index
    %c0_10 = arith.constant 0 : index
    %c0_11 = arith.constant 0 : index
    %12 = vector.load %arg3[%c1, %c0_10, %c0_11] : memref<3x32x32xf32, #tpu.memory_space<vmem>>, vector<1x32x32xf32>
    %13 = vector.shape_cast %12 : vector<1x32x32xf32> to vector<32x32xf32>
    %cst_12 = arith.constant dense<0.000000e+00> : vector<16x32xf32>
    %14 = tpu.matmul %0, %13, %cst_12 {dimension_numbers = #tpu.dot_dimension_numbers<[1], [0], [0], [1], [0, 0, 1, 1], [], []>} : vector<16x32xf32>, vector<32x32xf32>, vector<16x32xf32> -> vector<16x32xf32>
    %c1_13 = arith.constant 1 : index
    %c0_14 = arith.constant 0 : index
    %c0_15 = arith.constant 0 : index
    %15 = vector.load %arg5[%c1_13, %c0_14, %c0_15] : memref<3x1x32xf32, #tpu.memory_space<vmem>>, vector<1x1x32xf32>
    %16 = vector.shape_cast %15 : vector<1x1x32xf32> to vector<1x32xf32>
    %17 = vector.broadcast %16 : vector<1x32xf32> to vector<16x32xf32>
    %18 = arith.addf %14, %17 : vector<16x32xf32>
    %c1_16 = arith.constant 1 : index
    %c0_17 = arith.constant 0 : index
    %c0_18 = arith.constant 0 : index
    %19 = vector.load %arg6[%c1_16, %c0_17, %c0_18] : memref<3x1x32xf32, #tpu.memory_space<vmem>>, vector<1x1x32xf32>
    %20 = vector.shape_cast %19 : vector<1x1x32xf32> to vector<1x32xf32>
    %21 = vector.broadcast %20 : vector<1x32xf32> to vector<16x32xf32>
    %22 = arith.addf %18, %21 : vector<16x32xf32>
    %c2 = arith.constant 2 : index
    %c0_19 = arith.constant 0 : index
    %c0_20 = arith.constant 0 : index
    %23 = vector.load %arg3[%c2, %c0_19, %c0_20] : memref<3x32x32xf32, #tpu.memory_space<vmem>>, vector<1x32x32xf32>
    %24 = vector.shape_cast %23 : vector<1x32x32xf32> to vector<32x32xf32>
    %cst_21 = arith.constant dense<0.000000e+00> : vector<16x32xf32>
    %25 = tpu.matmul %0, %24, %cst_21 {dimension_numbers = #tpu.dot_dimension_numbers<[1], [0], [0], [1], [0, 0, 1, 1], [], []>} : vector<16x32xf32>, vector<32x32xf32>, vector<16x32xf32> -> vector<16x32xf32>
    %c2_22 = arith.constant 2 : index
    %c0_23 = arith.constant 0 : index
    %c0_24 = arith.constant 0 : index
    %26 = vector.load %arg5[%c2_22, %c0_23, %c0_24] : memref<3x1x32xf32, #tpu.memory_space<vmem>>, vector<1x1x32xf32>
    %27 = vector.shape_cast %26 : vector<1x1x32xf32> to vector<1x32xf32>
    %28 = vector.broadcast %27 : vector<1x32xf32> to vector<16x32xf32>
    %29 = arith.addf %25, %28 : vector<16x32xf32>
    %c2_25 = arith.constant 2 : index
    %c0_26 = arith.constant 0 : index
    %c0_27 = arith.constant 0 : index
    %30 = vector.load %arg6[%c2_25, %c0_26, %c0_27] : memref<3x1x32xf32, #tpu.memory_space<vmem>>, vector<1x1x32xf32>
    %31 = vector.shape_cast %30 : vector<1x1x32xf32> to vector<1x32xf32>
    %c0_28 = arith.constant 0 : index
    %c0_29 = arith.constant 0 : index
    %c0_30 = arith.constant 0 : index
    %32 = vector.load %arg4[%c0_28, %c0_29, %c0_30] : memref<3x32x32xf32, #tpu.memory_space<vmem>>, vector<1x32x32xf32>
    %33 = vector.shape_cast %32 : vector<1x32x32xf32> to vector<32x32xf32>
    %c1_31 = arith.constant 1 : index
    %c0_32 = arith.constant 0 : index
    %c0_33 = arith.constant 0 : index
    %34 = vector.load %arg4[%c1_31, %c0_32, %c0_33] : memref<3x32x32xf32, #tpu.memory_space<vmem>>, vector<1x32x32xf32>
    %35 = vector.shape_cast %34 : vector<1x32x32xf32> to vector<32x32xf32>
    %c2_34 = arith.constant 2 : index
    %c0_35 = arith.constant 0 : index
    %c0_36 = arith.constant 0 : index
    %36 = vector.load %arg4[%c2_34, %c0_35, %c0_36] : memref<3x32x32xf32, #tpu.memory_space<vmem>>, vector<1x32x32xf32>
    %37 = vector.shape_cast %36 : vector<1x32x32xf32> to vector<32x32xf32>
    %c0_37 = arith.constant 0 : index
    %c0_38 = arith.constant 0 : index
    %38 = vector.load %arg2[%c0_37, %c0_38] : memref<2x32xf32, #tpu.memory_space<vmem>>, vector<2x32xf32>
    %cst_39 = arith.constant dense<0.000000e+00> : vector<2x32xf32>
    %39 = tpu.matmul %38, %33, %cst_39 {dimension_numbers = #tpu.dot_dimension_numbers<[1], [0], [0], [1], [0, 0, 1, 1], [], []>} : vector<2x32xf32>, vector<32x32xf32>, vector<2x32xf32> -> vector<2x32xf32>
    %cst_40 = arith.constant dense<0.000000e+00> : vector<2x32xf32>
    %40 = tpu.matmul %38, %35, %cst_40 {dimension_numbers = #tpu.dot_dimension_numbers<[1], [0], [0], [1], [0, 0, 1, 1], [], []>} : vector<2x32xf32>, vector<32x32xf32>, vector<2x32xf32> -> vector<2x32xf32>
    %cst_41 = arith.constant dense<0.000000e+00> : vector<2x32xf32>
    %41 = tpu.matmul %38, %37, %cst_41 {dimension_numbers = #tpu.dot_dimension_numbers<[1], [0], [0], [1], [0, 0, 1, 1], [], []>} : vector<2x32xf32>, vector<32x32xf32>, vector<2x32xf32> -> vector<2x32xf32>
    %42 = vector.broadcast %31 : vector<1x32xf32> to vector<2x32xf32>
    %43 = arith.addf %41, %42 : vector<2x32xf32>
    %44 = vector.extract_strided_slice %11 {offsets = [0, 0], sizes = [2, 32], strides = [1, 1]} : vector<16x32xf32> to vector<2x32xf32>
    %45 = arith.addf %44, %39 : vector<2x32xf32>
    %46 = arith.negf %45 : vector<2x32xf32>
    %47 = math.exp %46 : vector<2x32xf32>
    %cst_42 = arith.constant 1.000000e+00 : f32
    %48 = vector.broadcast %cst_42 : f32 to vector<2x32xf32>
    %49 = arith.addf %48, %47 : vector<2x32xf32>
    %50 = arith.divf %48, %49 : vector<2x32xf32>
    %51 = vector.extract_strided_slice %22 {offsets = [0, 0], sizes = [2, 32], strides = [1, 1]} : vector<16x32xf32> to vector<2x32xf32>
    %52 = arith.addf %51, %40 : vector<2x32xf32>
    %53 = arith.negf %52 : vector<2x32xf32>
    %54 = math.exp %53 : vector<2x32xf32>
    %cst_43 = arith.constant 1.000000e+00 : f32
    %55 = vector.broadcast %cst_43 : f32 to vector<2x32xf32>
    %56 = arith.addf %55, %54 : vector<2x32xf32>
    %57 = arith.divf %55, %56 : vector<2x32xf32>
    %58 = vector.extract_strided_slice %29 {offsets = [0, 0], sizes = [2, 32], strides = [1, 1]} : vector<16x32xf32> to vector<2x32xf32>
    %59 = arith.mulf %50, %43 : vector<2x32xf32>
    %60 = arith.addf %58, %59 : vector<2x32xf32>
    %61 = math.tanh %60 : vector<2x32xf32>
    %62 = arith.subf %38, %61 : vector<2x32xf32>
    %63 = arith.mulf %57, %62 : vector<2x32xf32>
    %64 = arith.addf %61, %63 : vector<2x32xf32>
    %65 = vector.shape_cast %64 : vector<2x32xf32> to vector<2x1x32xf32>
    %c0_44 = arith.constant 0 : index
    %c0_45 = arith.constant 0 : index
    %c0_46 = arith.constant 0 : index
    %66 = vector.load %arg7[%c0_44, %c0_45, %c0_46] : memref<2x8x32xf32, #tpu.memory_space<vmem>>, vector<2x1x32xf32>
    tpu.vector_store %arg7[%c0_44, %c0_45, %c0_46], %65 {strides = array<i32>} : memref<2x8x32xf32, #tpu.memory_space<vmem>>, vector<2x1x32xf32>,
    %cst_47 = arith.constant dense<0.000000e+00> : vector<2x32xf32>
    %67 = tpu.matmul %64, %33, %cst_47 {dimension_numbers = #tpu.dot_dimension_numbers<[1], [0], [0], [1], [0, 0, 1, 1], [], []>} : vector<2x32xf32>, vector<32x32xf32>, vector<2x32xf32> -> vector<2x32xf32>
    %cst_48 = arith.constant dense<0.000000e+00> : vector<2x32xf32>
    %68 = tpu.matmul %64, %35, %cst_48 {dimension_numbers = #tpu.dot_dimension_numbers<[1], [0], [0], [1], [0, 0, 1, 1], [], []>} : vector<2x32xf32>, vector<32x32xf32>, vector<2x32xf32> -> vector<2x32xf32>
    %cst_49 = arith.constant dense<0.000000e+00> : vector<2x32xf32>
    %69 = tpu.matmul %64, %37, %cst_49 {dimension_numbers = #tpu.dot_dimension_numbers<[1], [0], [0], [1], [0, 0, 1, 1], [], []>} : vector<2x32xf32>, vector<32x32xf32>, vector<2x32xf32> -> vector<2x32xf32>
    %70 = vector.broadcast %31 : vector<1x32xf32> to vector<2x32xf32>
    %71 = arith.addf %69, %70 : vector<2x32xf32>
    %72 = vector.extract_strided_slice %11 {offsets = [2, 0], sizes = [2, 32], strides = [1, 1]} : vector<16x32xf32> to vector<2x32xf32>
    %73 = arith.addf %72, %67 : vector<2x32xf32>
    %74 = arith.negf %73 : vector<2x32xf32>
    %75 = math.exp %74 : vector<2x32xf32>
    %cst_50 = arith.constant 1.000000e+00 : f32
    %76 = vector.broadcast %cst_50 : f32 to vector<2x32xf32>
    %77 = arith.addf %76, %75 : vector<2x32xf32>
    %78 = arith.divf %76, %77 : vector<2x32xf32>
    %79 = vector.extract_strided_slice %22 {offsets = [2, 0], sizes = [2, 32], strides = [1, 1]} : vector<16x32xf32> to vector<2x32xf32>
    %80 = arith.addf %79, %68 : vector<2x32xf32>
    %81 = arith.negf %80 : vector<2x32xf32>
    %82 = math.exp %81 : vector<2x32xf32>
    %cst_51 = arith.constant 1.000000e+00 : f32
    %83 = vector.broadcast %cst_51 : f32 to vector<2x32xf32>
    %84 = arith.addf %83, %82 : vector<2x32xf32>
    %85 = arith.divf %83, %84 : vector<2x32xf32>
    %86 = vector.extract_strided_slice %29 {offsets = [2, 0], sizes = [2, 32], strides = [1, 1]} : vector<16x32xf32> to vector<2x32xf32>
    %87 = arith.mulf %78, %71 : vector<2x32xf32>
    %88 = arith.addf %86, %87 : vector<2x32xf32>
    %89 = math.tanh %88 : vector<2x32xf32>
    %90 = arith.subf %64, %89 : vector<2x32xf32>
    %91 = arith.mulf %85, %90 : vector<2x32xf32>
    %92 = arith.addf %89, %91 : vector<2x32xf32>
    %93 = vector.shape_cast %92 : vector<2x32xf32> to vector<2x1x32xf32>
    %c0_52 = arith.constant 0 : index
    %c1_53 = arith.constant 1 : index
    %c0_54 = arith.constant 0 : index
    %94 = vector.load %arg7[%c0_52, %c1_53, %c0_54] : memref<2x8x32xf32, #tpu.memory_space<vmem>>, vector<2x1x32xf32>
    tpu.vector_store %arg7[%c0_52, %c1_53, %c0_54], %93 {strides = array<i32>} : memref<2x8x32xf32, #tpu.memory_space<vmem>>, vector<2x1x32xf32>,
    %cst_55 = arith.constant dense<0.000000e+00> : vector<2x32xf32>
    %95 = tpu.matmul %92, %33, %cst_55 {dimension_numbers = #tpu.dot_dimension_numbers<[1], [0], [0], [1], [0, 0, 1, 1], [], []>} : vector<2x32xf32>, vector<32x32xf32>, vector<2x32xf32> -> vector<2x32xf32>
    %cst_56 = arith.constant dense<0.000000e+00> : vector<2x32xf32>
    %96 = tpu.matmul %92, %35, %cst_56 {dimension_numbers = #tpu.dot_dimension_numbers<[1], [0], [0], [1], [0, 0, 1, 1], [], []>} : vector<2x32xf32>, vector<32x32xf32>, vector<2x32xf32> -> vector<2x32xf32>
    %cst_57 = arith.constant dense<0.000000e+00> : vector<2x32xf32>
    %97 = tpu.matmul %92, %37, %cst_57 {dimension_numbers = #tpu.dot_dimension_numbers<[1], [0], [0], [1], [0, 0, 1, 1], [], []>} : vector<2x32xf32>, vector<32x32xf32>, vector<2x32xf32> -> vector<2x32xf32>
    %98 = vector.broadcast %31 : vector<1x32xf32> to vector<2x32xf32>
    %99 = arith.addf %97, %98 : vector<2x32xf32>
    %100 = vector.extract_strided_slice %11 {offsets = [4, 0], sizes = [2, 32], strides = [1, 1]} : vector<16x32xf32> to vector<2x32xf32>
    %101 = arith.addf %100, %95 : vector<2x32xf32>
    %102 = arith.negf %101 : vector<2x32xf32>
    %103 = math.exp %102 : vector<2x32xf32>
    %cst_58 = arith.constant 1.000000e+00 : f32
    %104 = vector.broadcast %cst_58 : f32 to vector<2x32xf32>
    %105 = arith.addf %104, %103 : vector<2x32xf32>
    %106 = arith.divf %104, %105 : vector<2x32xf32>
    %107 = vector.extract_strided_slice %22 {offsets = [4, 0], sizes = [2, 32], strides = [1, 1]} : vector<16x32xf32> to vector<2x32xf32>
    %108 = arith.addf %107, %96 : vector<2x32xf32>
    %109 = arith.negf %108 : vector<2x32xf32>
    %110 = math.exp %109 : vector<2x32xf32>
    %cst_59 = arith.constant 1.000000e+00 : f32
    %111 = vector.broadcast %cst_59 : f32 to vector<2x32xf32>
    %112 = arith.addf %111, %110 : vector<2x32xf32>
    %113 = arith.divf %111, %112 : vector<2x32xf32>
    %114 = vector.extract_strided_slice %29 {offsets = [4, 0], sizes = [2, 32], strides = [1, 1]} : vector<16x32xf32> to vector<2x32xf32>
    %115 = arith.mulf %106, %99 : vector<2x32xf32>
    %116 = arith.addf %114, %115 : vector<2x32xf32>
    %117 = math.tanh %116 : vector<2x32xf32>
    %118 = arith.subf %92, %117 : vector<2x32xf32>
    %119 = arith.mulf %113, %118 : vector<2x32xf32>
    %120 = arith.addf %117, %119 : vector<2x32xf32>
    %121 = vector.shape_cast %120 : vector<2x32xf32> to vector<2x1x32xf32>
    %c0_60 = arith.constant 0 : index
    %c2_61 = arith.constant 2 : index
    %c0_62 = arith.constant 0 : index
    %122 = vector.load %arg7[%c0_60, %c2_61, %c0_62] : memref<2x8x32xf32, #tpu.memory_space<vmem>>, vector<2x1x32xf32>
    tpu.vector_store %arg7[%c0_60, %c2_61, %c0_62], %121 {strides = array<i32>} : memref<2x8x32xf32, #tpu.memory_space<vmem>>, vector<2x1x32xf32>,
    %cst_63 = arith.constant dense<0.000000e+00> : vector<2x32xf32>
    %123 = tpu.matmul %120, %33, %cst_63 {dimension_numbers = #tpu.dot_dimension_numbers<[1], [0], [0], [1], [0, 0, 1, 1], [], []>} : vector<2x32xf32>, vector<32x32xf32>, vector<2x32xf32> -> vector<2x32xf32>
    %cst_64 = arith.constant dense<0.000000e+00> : vector<2x32xf32>
    %124 = tpu.matmul %120, %35, %cst_64 {dimension_numbers = #tpu.dot_dimension_numbers<[1], [0], [0], [1], [0, 0, 1, 1], [], []>} : vector<2x32xf32>, vector<32x32xf32>, vector<2x32xf32> -> vector<2x32xf32>
    %cst_65 = arith.constant dense<0.000000e+00> : vector<2x32xf32>
    %125 = tpu.matmul %120, %37, %cst_65 {dimension_numbers = #tpu.dot_dimension_numbers<[1], [0], [0], [1], [0, 0, 1, 1], [], []>} : vector<2x32xf32>, vector<32x32xf32>, vector<2x32xf32> -> vector<2x32xf32>
    %126 = vector.broadcast %31 : vector<1x32xf32> to vector<2x32xf32>
    %127 = arith.addf %125, %126 : vector<2x32xf32>
    %128 = vector.extract_strided_slice %11 {offsets = [6, 0], sizes = [2, 32], strides = [1, 1]} : vector<16x32xf32> to vector<2x32xf32>
    %129 = arith.addf %128, %123 : vector<2x32xf32>
    %130 = arith.negf %129 : vector<2x32xf32>
    %131 = math.exp %130 : vector<2x32xf32>
    %cst_66 = arith.constant 1.000000e+00 : f32
    %132 = vector.broadcast %cst_66 : f32 to vector<2x32xf32>
    %133 = arith.addf %132, %131 : vector<2x32xf32>
    %134 = arith.divf %132, %133 : vector<2x32xf32>
    %135 = vector.extract_strided_slice %22 {offsets = [6, 0], sizes = [2, 32], strides = [1, 1]} : vector<16x32xf32> to vector<2x32xf32>
    %136 = arith.addf %135, %124 : vector<2x32xf32>
    %137 = arith.negf %136 : vector<2x32xf32>
    %138 = math.exp %137 : vector<2x32xf32>
    %cst_67 = arith.constant 1.000000e+00 : f32
    %139 = vector.broadcast %cst_67 : f32 to vector<2x32xf32>
    %140 = arith.addf %139, %138 : vector<2x32xf32>
    %141 = arith.divf %139, %140 : vector<2x32xf32>
    %142 = vector.extract_strided_slice %29 {offsets = [6, 0], sizes = [2, 32], strides = [1, 1]} : vector<16x32xf32> to vector<2x32xf32>
    %143 = arith.mulf %134, %127 : vector<2x32xf32>
    %144 = arith.addf %142, %143 : vector<2x32xf32>
    %145 = math.tanh %144 : vector<2x32xf32>
    %146 = arith.subf %120, %145 : vector<2x32xf32>
    %147 = arith.mulf %141, %146 : vector<2x32xf32>
    %148 = arith.addf %145, %147 : vector<2x32xf32>
    %149 = vector.shape_cast %148 : vector<2x32xf32> to vector<2x1x32xf32>
    %c0_68 = arith.constant 0 : index
    %c3 = arith.constant 3 : index
    %c0_69 = arith.constant 0 : index
    %150 = vector.load %arg7[%c0_68, %c3, %c0_69] : memref<2x8x32xf32, #tpu.memory_space<vmem>>, vector<2x1x32xf32>
    tpu.vector_store %arg7[%c0_68, %c3, %c0_69], %149 {strides = array<i32>} : memref<2x8x32xf32, #tpu.memory_space<vmem>>, vector<2x1x32xf32>,
    %cst_70 = arith.constant dense<0.000000e+00> : vector<2x32xf32>
    %151 = tpu.matmul %148, %33, %cst_70 {dimension_numbers = #tpu.dot_dimension_numbers<[1], [0], [0], [1], [0, 0, 1, 1], [], []>} : vector<2x32xf32>, vector<32x32xf32>, vector<2x32xf32> -> vector<2x32xf32>
    %cst_71 = arith.constant dense<0.000000e+00> : vector<2x32xf32>
    %152 = tpu.matmul %148, %35, %cst_71 {dimension_numbers = #tpu.dot_dimension_numbers<[1], [0], [0], [1], [0, 0, 1, 1], [], []>} : vector<2x32xf32>, vector<32x32xf32>, vector<2x32xf32> -> vector<2x32xf32>
    %cst_72 = arith.constant dense<0.000000e+00> : vector<2x32xf32>
    %153 = tpu.matmul %148, %37, %cst_72 {dimension_numbers = #tpu.dot_dimension_numbers<[1], [0], [0], [1], [0, 0, 1, 1], [], []>} : vector<2x32xf32>, vector<32x32xf32>, vector<2x32xf32> -> vector<2x32xf32>
    %154 = vector.broadcast %31 : vector<1x32xf32> to vector<2x32xf32>
    %155 = arith.addf %153, %154 : vector<2x32xf32>
    %156 = vector.extract_strided_slice %11 {offsets = [8, 0], sizes = [2, 32], strides = [1, 1]} : vector<16x32xf32> to vector<2x32xf32>
    %157 = arith.addf %156, %151 : vector<2x32xf32>
    %158 = arith.negf %157 : vector<2x32xf32>
    %159 = math.exp %158 : vector<2x32xf32>
    %cst_73 = arith.constant 1.000000e+00 : f32
    %160 = vector.broadcast %cst_73 : f32 to vector<2x32xf32>
    %161 = arith.addf %160, %159 : vector<2x32xf32>
    %162 = arith.divf %160, %161 : vector<2x32xf32>
    %163 = vector.extract_strided_slice %22 {offsets = [8, 0], sizes = [2, 32], strides = [1, 1]} : vector<16x32xf32> to vector<2x32xf32>
    %164 = arith.addf %163, %152 : vector<2x32xf32>
    %165 = arith.negf %164 : vector<2x32xf32>
    %166 = math.exp %165 : vector<2x32xf32>
    %cst_74 = arith.constant 1.000000e+00 : f32
    %167 = vector.broadcast %cst_74 : f32 to vector<2x32xf32>
    %168 = arith.addf %167, %166 : vector<2x32xf32>
    %169 = arith.divf %167, %168 : vector<2x32xf32>
    %170 = vector.extract_strided_slice %29 {offsets = [8, 0], sizes = [2, 32], strides = [1, 1]} : vector<16x32xf32> to vector<2x32xf32>
    %171 = arith.mulf %162, %155 : vector<2x32xf32>
    %172 = arith.addf %170, %171 : vector<2x32xf32>
    %173 = math.tanh %172 : vector<2x32xf32>
    %174 = arith.subf %148, %173 : vector<2x32xf32>
    %175 = arith.mulf %169, %174 : vector<2x32xf32>
    %176 = arith.addf %173, %175 : vector<2x32xf32>
    %177 = vector.shape_cast %176 : vector<2x32xf32> to vector<2x1x32xf32>
    %c0_75 = arith.constant 0 : index
    %c4 = arith.constant 4 : index
    %c0_76 = arith.constant 0 : index
    %178 = vector.load %arg7[%c0_75, %c4, %c0_76] : memref<2x8x32xf32, #tpu.memory_space<vmem>>, vector<2x1x32xf32>
    tpu.vector_store %arg7[%c0_75, %c4, %c0_76], %177 {strides = array<i32>} : memref<2x8x32xf32, #tpu.memory_space<vmem>>, vector<2x1x32xf32>,
    %cst_77 = arith.constant dense<0.000000e+00> : vector<2x32xf32>
    %179 = tpu.matmul %176, %33, %cst_77 {dimension_numbers = #tpu.dot_dimension_numbers<[1], [0], [0], [1], [0, 0, 1, 1], [], []>} : vector<2x32xf32>, vector<32x32xf32>, vector<2x32xf32> -> vector<2x32xf32>
    %cst_78 = arith.constant dense<0.000000e+00> : vector<2x32xf32>
    %180 = tpu.matmul %176, %35, %cst_78 {dimension_numbers = #tpu.dot_dimension_numbers<[1], [0], [0], [1], [0, 0, 1, 1], [], []>} : vector<2x32xf32>, vector<32x32xf32>, vector<2x32xf32> -> vector<2x32xf32>
    %cst_79 = arith.constant dense<0.000000e+00> : vector<2x32xf32>
    %181 = tpu.matmul %176, %37, %cst_79 {dimension_numbers = #tpu.dot_dimension_numbers<[1], [0], [0], [1], [0, 0, 1, 1], [], []>} : vector<2x32xf32>, vector<32x32xf32>, vector<2x32xf32> -> vector<2x32xf32>
    %182 = vector.broadcast %31 : vector<1x32xf32> to vector<2x32xf32>
    %183 = arith.addf %181, %182 : vector<2x32xf32>
    %184 = vector.extract_strided_slice %11 {offsets = [10, 0], sizes = [2, 32], strides = [1, 1]} : vector<16x32xf32> to vector<2x32xf32>
    %185 = arith.addf %184, %179 : vector<2x32xf32>
    %186 = arith.negf %185 : vector<2x32xf32>
    %187 = math.exp %186 : vector<2x32xf32>
    %cst_80 = arith.constant 1.000000e+00 : f32
    %188 = vector.broadcast %cst_80 : f32 to vector<2x32xf32>
    %189 = arith.addf %188, %187 : vector<2x32xf32>
    %190 = arith.divf %188, %189 : vector<2x32xf32>
    %191 = vector.extract_strided_slice %22 {offsets = [10, 0], sizes = [2, 32], strides = [1, 1]} : vector<16x32xf32> to vector<2x32xf32>
    %192 = arith.addf %191, %180 : vector<2x32xf32>
    %193 = arith.negf %192 : vector<2x32xf32>
    %194 = math.exp %193 : vector<2x32xf32>
    %cst_81 = arith.constant 1.000000e+00 : f32
    %195 = vector.broadcast %cst_81 : f32 to vector<2x32xf32>
    %196 = arith.addf %195, %194 : vector<2x32xf32>
    %197 = arith.divf %195, %196 : vector<2x32xf32>
    %198 = vector.extract_strided_slice %29 {offsets = [10, 0], sizes = [2, 32], strides = [1, 1]} : vector<16x32xf32> to vector<2x32xf32>
    %199 = arith.mulf %190, %183 : vector<2x32xf32>
    %200 = arith.addf %198, %199 : vector<2x32xf32>
    %201 = math.tanh %200 : vector<2x32xf32>
    %202 = arith.subf %176, %201 : vector<2x32xf32>
    %203 = arith.mulf %197, %202 : vector<2x32xf32>
    %204 = arith.addf %201, %203 : vector<2x32xf32>
    %205 = vector.shape_cast %204 : vector<2x32xf32> to vector<2x1x32xf32>
    %c0_82 = arith.constant 0 : index
    %c5 = arith.constant 5 : index
    %c0_83 = arith.constant 0 : index
    %206 = vector.load %arg7[%c0_82, %c5, %c0_83] : memref<2x8x32xf32, #tpu.memory_space<vmem>>, vector<2x1x32xf32>
    tpu.vector_store %arg7[%c0_82, %c5, %c0_83], %205 {strides = array<i32>} : memref<2x8x32xf32, #tpu.memory_space<vmem>>, vector<2x1x32xf32>,
    %cst_84 = arith.constant dense<0.000000e+00> : vector<2x32xf32>
    %207 = tpu.matmul %204, %33, %cst_84 {dimension_numbers = #tpu.dot_dimension_numbers<[1], [0], [0], [1], [0, 0, 1, 1], [], []>} : vector<2x32xf32>, vector<32x32xf32>, vector<2x32xf32> -> vector<2x32xf32>
    %cst_85 = arith.constant dense<0.000000e+00> : vector<2x32xf32>
    %208 = tpu.matmul %204, %35, %cst_85 {dimension_numbers = #tpu.dot_dimension_numbers<[1], [0], [0], [1], [0, 0, 1, 1], [], []>} : vector<2x32xf32>, vector<32x32xf32>, vector<2x32xf32> -> vector<2x32xf32>
    %cst_86 = arith.constant dense<0.000000e+00> : vector<2x32xf32>
    %209 = tpu.matmul %204, %37, %cst_86 {dimension_numbers = #tpu.dot_dimension_numbers<[1], [0], [0], [1], [0, 0, 1, 1], [], []>} : vector<2x32xf32>, vector<32x32xf32>, vector<2x32xf32> -> vector<2x32xf32>
    %210 = vector.broadcast %31 : vector<1x32xf32> to vector<2x32xf32>
    %211 = arith.addf %209, %210 : vector<2x32xf32>
    %212 = vector.extract_strided_slice %11 {offsets = [12, 0], sizes = [2, 32], strides = [1, 1]} : vector<16x32xf32> to vector<2x32xf32>
    %213 = arith.addf %212, %207 : vector<2x32xf32>
    %214 = arith.negf %213 : vector<2x32xf32>
    %215 = math.exp %214 : vector<2x32xf32>
    %cst_87 = arith.constant 1.000000e+00 : f32
    %216 = vector.broadcast %cst_87 : f32 to vector<2x32xf32>
    %217 = arith.addf %216, %215 : vector<2x32xf32>
    %218 = arith.divf %216, %217 : vector<2x32xf32>
    %219 = vector.extract_strided_slice %22 {offsets = [12, 0], sizes = [2, 32], strides = [1, 1]} : vector<16x32xf32> to vector<2x32xf32>
    %220 = arith.addf %219, %208 : vector<2x32xf32>
    %221 = arith.negf %220 : vector<2x32xf32>
    %222 = math.exp %221 : vector<2x32xf32>
    %cst_88 = arith.constant 1.000000e+00 : f32
    %223 = vector.broadcast %cst_88 : f32 to vector<2x32xf32>
    %224 = arith.addf %223, %222 : vector<2x32xf32>
    %225 = arith.divf %223, %224 : vector<2x32xf32>
    %226 = vector.extract_strided_slice %29 {offsets = [12, 0], sizes = [2, 32], strides = [1, 1]} : vector<16x32xf32> to vector<2x32xf32>
    %227 = arith.mulf %218, %211 : vector<2x32xf32>
    %228 = arith.addf %226, %227 : vector<2x32xf32>
    %229 = math.tanh %228 : vector<2x32xf32>
    %230 = arith.subf %204, %229 : vector<2x32xf32>
    %231 = arith.mulf %225, %230 : vector<2x32xf32>
    %232 = arith.addf %229, %231 : vector<2x32xf32>
    %233 = vector.shape_cast %232 : vector<2x32xf32> to vector<2x1x32xf32>
    %c0_89 = arith.constant 0 : index
    %c6 = arith.constant 6 : index
    %c0_90 = arith.constant 0 : index
    %234 = vector.load %arg7[%c0_89, %c6, %c0_90] : memref<2x8x32xf32, #tpu.memory_space<vmem>>, vector<2x1x32xf32>
    tpu.vector_store %arg7[%c0_89, %c6, %c0_90], %233 {strides = array<i32>} : memref<2x8x32xf32, #tpu.memory_space<vmem>>, vector<2x1x32xf32>,
    %cst_91 = arith.constant dense<0.000000e+00> : vector<2x32xf32>
    %235 = tpu.matmul %232, %33, %cst_91 {dimension_numbers = #tpu.dot_dimension_numbers<[1], [0], [0], [1], [0, 0, 1, 1], [], []>} : vector<2x32xf32>, vector<32x32xf32>, vector<2x32xf32> -> vector<2x32xf32>
    %cst_92 = arith.constant dense<0.000000e+00> : vector<2x32xf32>
    %236 = tpu.matmul %232, %35, %cst_92 {dimension_numbers = #tpu.dot_dimension_numbers<[1], [0], [0], [1], [0, 0, 1, 1], [], []>} : vector<2x32xf32>, vector<32x32xf32>, vector<2x32xf32> -> vector<2x32xf32>
    %cst_93 = arith.constant dense<0.000000e+00> : vector<2x32xf32>
    %237 = tpu.matmul %232, %37, %cst_93 {dimension_numbers = #tpu.dot_dimension_numbers<[1], [0], [0], [1], [0, 0, 1, 1], [], []>} : vector<2x32xf32>, vector<32x32xf32>, vector<2x32xf32> -> vector<2x32xf32>
    %238 = vector.broadcast %31 : vector<1x32xf32> to vector<2x32xf32>
    %239 = arith.addf %237, %238 : vector<2x32xf32>
    %240 = vector.extract_strided_slice %11 {offsets = [14, 0], sizes = [2, 32], strides = [1, 1]} : vector<16x32xf32> to vector<2x32xf32>
    %241 = arith.addf %240, %235 : vector<2x32xf32>
    %242 = arith.negf %241 : vector<2x32xf32>
    %243 = math.exp %242 : vector<2x32xf32>
    %cst_94 = arith.constant 1.000000e+00 : f32
    %244 = vector.broadcast %cst_94 : f32 to vector<2x32xf32>
    %245 = arith.addf %244, %243 : vector<2x32xf32>
    %246 = arith.divf %244, %245 : vector<2x32xf32>
    %247 = vector.extract_strided_slice %22 {offsets = [14, 0], sizes = [2, 32], strides = [1, 1]} : vector<16x32xf32> to vector<2x32xf32>
    %248 = arith.addf %247, %236 : vector<2x32xf32>
    %249 = arith.negf %248 : vector<2x32xf32>
    %250 = math.exp %249 : vector<2x32xf32>
    %cst_95 = arith.constant 1.000000e+00 : f32
    %251 = vector.broadcast %cst_95 : f32 to vector<2x32xf32>
    %252 = arith.addf %251, %250 : vector<2x32xf32>
    %253 = arith.divf %251, %252 : vector<2x32xf32>
    %254 = vector.extract_strided_slice %29 {offsets = [14, 0], sizes = [2, 32], strides = [1, 1]} : vector<16x32xf32> to vector<2x32xf32>
    %255 = arith.mulf %246, %239 : vector<2x32xf32>
    %256 = arith.addf %254, %255 : vector<2x32xf32>
    %257 = math.tanh %256 : vector<2x32xf32>
    %258 = arith.subf %232, %257 : vector<2x32xf32>
    %259 = arith.mulf %253, %258 : vector<2x32xf32>
    %260 = arith.addf %257, %259 : vector<2x32xf32>
    %261 = vector.shape_cast %260 : vector<2x32xf32> to vector<2x1x32xf32>
    %c0_96 = arith.constant 0 : index
    %c7 = arith.constant 7 : index
    %c0_97 = arith.constant 0 : index
    %262 = vector.load %arg7[%c0_96, %c7, %c0_97] : memref<2x8x32xf32, #tpu.memory_space<vmem>>, vector<2x1x32xf32>
    tpu.vector_store %arg7[%c0_96, %c7, %c0_97], %261 {strides = array<i32>} : memref<2x8x32xf32, #tpu.memory_space<vmem>>, vector<2x1x32xf32>,
    %c0_98 = arith.constant 0 : index
    %c0_99 = arith.constant 0 : index
    %263 = vector.load %arg8[%c0_98, %c0_99] : memref<2x32xf32, #tpu.memory_space<vmem>>, vector<2x32xf32>
    tpu.vector_store %arg8[%c0_98, %c0_99], %260 {strides = array<i32>} : memref<2x32xf32, #tpu.memory_space<vmem>>, vector<2x32xf32>,
    return
  }
  func.func @transform_0(%arg0: i32) -> (i32, i32) {
    %c0_i32 = arith.constant 0 : i32
    %c0_i32_0 = arith.constant 0 : i32
    %c0_i32_1 = arith.constant 0 : i32
    return %c0_i32, %c0_i32_0 : i32, i32
  }
  func.func @transform_1(%arg0: i32) -> (i32, i32) {
    %c0_i32 = arith.constant 0 : i32
    %c0_i32_0 = arith.constant 0 : i32
    %c0_i32_1 = arith.constant 0 : i32
    return %c0_i32, %c0_i32_0 : i32, i32
  }
  func.func @transform_2(%arg0: i32) -> (i32, i32, i32) {
    %c0_i32 = arith.constant 0 : i32
    %c0_i32_0 = arith.constant 0 : i32
    %c0_i32_1 = arith.constant 0 : i32
    %c0_i32_2 = arith.constant 0 : i32
    return %c0_i32, %c0_i32_0, %c0_i32_1 : i32, i32, i32
  }
  func.func @transform_3(%arg0: i32) -> (i32, i32, i32) {
    %c0_i32 = arith.constant 0 : i32
    %c0_i32_0 = arith.constant 0 : i32
    %c0_i32_1 = arith.constant 0 : i32
    %c0_i32_2 = arith.constant 0 : i32
    return %c0_i32, %c0_i32_0, %c0_i32_1 : i32, i32, i32
  }
  func.func @transform_4(%arg0: i32) -> (i32, i32, i32) {
    %c0_i32 = arith.constant 0 : i32
    %c0_i32_0 = arith.constant 0 : i32
    %c0_i32_1 = arith.constant 0 : i32
    %c0_i32_2 = arith.constant 0 : i32
    return %c0_i32, %c0_i32_0, %c0_i32_1 : i32, i32, i32
  }
  func.func @transform_5(%arg0: i32) -> (i32, i32, i32) {
    %c0_i32 = arith.constant 0 : i32
    %c0_i32_0 = arith.constant 0 : i32
    %c0_i32_1 = arith.constant 0 : i32
    %c0_i32_2 = arith.constant 0 : i32
    return %c0_i32, %c0_i32_0, %c0_i32_1 : i32, i32, i32
  }
  func.func @transform_6(%arg0: i32) -> (i32, i32, i32) {
    %c0_i32 = arith.constant 0 : i32
    %c0_i32_0 = arith.constant 0 : i32
    %c0_i32_1 = arith.constant 0 : i32
    %c0_i32_2 = arith.constant 0 : i32
    return %c0_i32, %c0_i32_0, %c0_i32_1 : i32, i32, i32
  }
  func.func @transform_7(%arg0: i32) -> (i32, i32) {
    %c0_i32 = arith.constant 0 : i32
    %c0_i32_0 = arith.constant 0 : i32
    %c0_i32_1 = arith.constant 0 : i32
    return %c0_i32, %c0_i32_0 : i32, i32
  }
}

</mosaic_0001>

<bundles_post_ra>
// kernel: encoder_rnn_forward.1
= control target key start
LH: loop header
LB: loop body
LE: loop exit
PB: predicated region body
PF: predicated region fallthrough
CT: control target
= control target key end

     0   :  { %13 = vsyncpa [#allocation3], 0  ;;  %vm37_vm0 = vcmask 261120   ;;  %s1844_s0 = inlined_call_operand.vmem [shape: f32[16,32], index: 0, kind: input, shape index: {}]   ;;  %s1845_s1 = inlined_call_operand.vmem [shape: f32[2,32], index: 1, kind: input, shape index: {}]   ;;  %s1846_s2 = inlined_call_operand.vmem [shape: f32[3,32,32], index: 2, kind: input, shape index: {}]   ;;  %s1847_s3 = inlined_call_operand.vmem [shape: f32[3,32,32], index: 3, kind: input, shape index: {}]   ;;  %s1848_s4 = inlined_call_operand.vmem [shape: f32[3,1,32], index: 4, kind: input, shape index: {}]   ;;  %s1849_s5 = inlined_call_operand.vmem [shape: f32[3,1,32], index: 5, kind: input, shape index: {}]   ;;  %s1850_s6 = inlined_call_operand.hbm [shape: f32[2,8,32], index: 6, kind: output, shape index: {0}]   ;;  %s1851_s7 = inlined_call_operand.hbm [shape: f32[2,32], index: 7, kind: output, shape index: {1}]  }
   0x1   :  { %v1494_v0 = vld [vmem:[%s1847_s3 + $0x18] sm:$0xff]  ;;  %v1502_v2 = vld [vmem:[%s1847_s3 + $0x10] sm:$0xff]  ;;  %v1511_v4 = vld [vmem:[%s1847_s3 + $0x8] sm:$0xff] }
   0x2   :  { %v32_v1 = vld [vmem:[%s1846_s2 + $0x18] sm:$0xff]  ;;  %178 = vmatpush.msra.mxu3 %v1494_v0  ;;  %v31_v3 = vld [vmem:[%s1846_s2 + $0x10] sm:$0xff]  ;;  %v30_v5 = vld [vmem:[%s1846_s2 + $0x8] sm:$0xff] }
   0x3   :  { %56 = vmatpush.msra.mxu0 %v32_v1  ;;  %v1244_v6 = vld [vmem:[%s1846_s2 + $0x38] sm:$0xff]  ;;  %v1523_v7 = vld [vmem:[%s1847_s3] sm:$0xff]  ;;  %v1243_v9 = vld [vmem:[%s1846_s2 + $0x30] sm:$0xff] }
   0x4   :  { %179 = vmatpush.msra.mxu3 %v1502_v2  ;;  %v29_v8 = vld [vmem:[%s1846_s2] sm:$0xff]  ;;  %95 = vmatpush.msra.mxu1 %v1244_v6  ;;  %v1543_v12 = vld [vmem:[%s1847_s3 + $0x38] sm:$0xff]  ;;  %v1242_v13 = vld [vmem:[%s1846_s2 + $0x28] sm:$0xff] }
   0x5   :  { %57 = vmatpush.msra.mxu0 %v31_v3  ;;  %v1535_v10 = vld [vmem:[%s1845_s1] sm:$0x3]  ;;  %v1552_v14 = vld [vmem:[%s1847_s3 + $0x30] sm:$0xff]  ;;  %v1557_v15 = vld [vmem:[%s1847_s3 + $0x58] sm:$0xff] }
   0x6   :  { %180 = vmatpush.msra.mxu3 %v1511_v4  ;;  %v27_v11 = vld [vmem:[%s1844_s0] sm:$0xff]  ;;  %96 = vmatpush.msra.mxu1 %v1243_v9  ;;  %v1252_v16 = vld [vmem:[%s1846_s2 + $0x58] sm:$0xff]  ;;  %v1568_v17 = vld [vmem:[%s1847_s3 + $0x28] sm:$0xff] }
   0x7   :  { %58 = vmatpush.msra.mxu0 %v30_v5  ;;  %v1241_v18 = vld [vmem:[%s1846_s2 + $0x20] sm:$0xff]  ;;  %v1576_v19 = vld [vmem:[%s1847_s3 + $0x50] sm:$0xff]  ;;  %135 = vmatpush.msra.mxu2 %v1252_v16  ;;  %v1587_v21 = vld [vmem:[%s1847_s3 + $0x48] sm:$0xff] }
   0x8   :  { %181 = vmatpush.msra.mxu3 %v1523_v7  ;;  %97 = vmatpush.msra.mxu1 %v1242_v13  ;;  %v1251_v20 = vld [vmem:[%s1846_s2 + $0x50] sm:$0xff] }
   0x9   :  { %59 = vmatpush.msra.mxu0 %v29_v8  ;;  %1265 = vmatmul.msk.f32.vlgmr.msra.gmra.mxu3 %vm37_vm0, %v1535_v10 }
   0xa   :  { %1239 = vmatmul.msk.f32.vlgmr.msra.gmra.mxu0 %vm37_vm0, %v27_v11  ;;  %198 = vmatpush.msrb.mxu3 %v1543_v12 }
   0xb   :  { %221 = vmatpush.msrb.mxu0 %v1557_v15  ;;  %98 = vmatpush.msra.mxu1 %v1241_v18 }
   0xc   :  { %199 = vmatpush.msrb.mxu3 %v1552_v14 }
   0xd   :  { %14 = vsyncpa [#allocation5], 0  ;;  %v1592_v22 = vld [vmem:[%s1847_s3 + $0x20] sm:$0xff]  ;;  %1246 = vmatmul.msk.f32.vlgmr.msra.gmra.mxu1 %vm37_vm0, %v27_v11  ;;  %222 = vmatpush.msrb.mxu0 %v1576_v19  ;;  %v1250_v23 = vld [vmem:[%s1846_s2 + $0x48] sm:$0xff]  ;;  %vm278_vm9 = vcmask 253952   ;;  %s1225_s18 = sshll.u32 %s1851_s7, 4  ;;  %s1226_s18 = int_to_ptr.hbm [resolvable:$true] %s1225_s18 }
   0xe   :  { %200 = vmatpush.msrb.mxu3 %v1568_v17  ;;  %136 = vmatpush.msra.mxu2 %v1251_v20  ;;  %v28_v24 = vld [vmem:[%s1844_s0 + $0x8] sm:$0xff]  ;;  %v1249_v25 = vld [vmem:[%s1846_s2 + $0x40] sm:$0xff]  ;;  %s1448_s19 = smov [#allocation2]   ;;  %s1211_s23 = sshll.u32 %s1850_s6, 4  ;;  %s1212_s23 = int_to_ptr.hbm [resolvable:$true] %s1211_s23 }
   0xf   :  { %223 = vmatpush.msrb.mxu0 %v1587_v21  ;;  %v1610_v26 = vld [vmem:[%s1847_s3 + $0x40] sm:$0xff]  ;;  %295 = vmatpush.msrb.mxu1 %v1494_v0  ;;  %s1209_s20 = sshll.u32 %s1448_s19, 4  ;;  %s1449_s7 = smov 128   ;;  %s1210_s20 = int_to_ptr.vmem [resolvable:$true] %s1209_s20 }
  0x10   :  { %201 = vmatpush.msrb.mxu3 %v1592_v22  ;;  %137 = vmatpush.msra.mxu2 %v1250_v23  ;;  %v1309_v27 = vld [vmem:[%s1848_s4] ss:$0 sm:$0xff]  ;;  %v1311_v32 = vld [vmem:[%s1848_s4 + $0x1] ss:$0 sm:$0xff]  ;;  %v1679_v55 = vld [vmem:[%s1849_s5 + $0x2] ss:$0 sm:$0xff] }
  0x11   :  { %1266 = vmatmul.msk.f32.vlgmr.msrb.gmra.mxu3 %vm37_vm0, %v1535_v10  ;;  %224 = vmatpush.msrb.mxu0 %v1610_v26  ;;  %v1310_v28 = vld [vmem:[%s1849_s5] ss:$0 sm:$0xff]  ;;  %v1312_v37 = vld [vmem:[%s1849_s5 + $0x1] ss:$0 sm:$0xff]  ;;  %v1684_v61 = vld [vmem:[%s1848_s4 + $0x2] ss:$0 sm:$0xff] }
  0x12   :  { %1240 = vmatmul.msk.f32.gmra.mxu0 %vm37_vm0, %v28_v24  ;;  %138 = vmatpush.msra.mxu2 %v1249_v25  ;;  %s1447_s4 = smov [#allocation4]   ;;  %s1450_s24 = smov 8  }
  0x13   :  { %1254 = vmatmul.msk.f32.vlgmr.msra.gmra.mxu2 %vm37_vm0, %v27_v11  ;;  %296 = vmatpush.msrb.mxu1 %v1502_v2  ;;  %s1223_s5 = sshll.u32 %s1447_s4, 4  ;;  %s1224_s5 = int_to_ptr.vmem [resolvable:$true] %s1223_s5 }
  0x14   :  { %315 = vmatpush.msrb.mxu2 %v1543_v12  ;;  %335 = vmatpush.msra.mxu3 %v1557_v15 }
  0x15   :  { %1247 = vmatmul.msk.f32.gmra.mxu1 %vm37_vm0, %v28_v24  ;;  %429 = vmatpush.msra.mxu0 %v1494_v0 }
  0x16   :  { %297 = vmatpush.msrb.mxu1 %v1511_v4  ;;  %316 = vmatpush.msrb.mxu2 %v1552_v14 }
  0x17   :  { %336 = vmatpush.msra.mxu3 %v1576_v19  ;;  %430 = vmatpush.msra.mxu0 %v1502_v2 }
  0x18   :  { %298 = vmatpush.msrb.mxu1 %v1523_v7  ;;  %317 = vmatpush.msrb.mxu2 %v1568_v17 }
  0x19   :  { %337 = vmatpush.msra.mxu3 %v1587_v21  ;;  %431 = vmatpush.msra.mxu0 %v1511_v4 }
  0x1a   :  { %1267 = vmatmul.msk.f32.vlgmr.msrb.gmra.mxu0 %vm37_vm0, %v1535_v10  ;;  %318 = vmatpush.msrb.mxu2 %v1592_v22 }
  0x1b   :  { %449 = vmatpush.msra.mxu1 %v1543_v12  ;;  %1255 = vmatmul.msk.f32.gmra.mxu2 %vm37_vm0, %v28_v24 }
  0x1c   :  { %338 = vmatpush.msra.mxu3 %v1610_v26  ;;  %469 = vmatpush.msra.mxu2 %v1557_v15 }
  0x1d   :  { %450 = vmatpush.msra.mxu1 %v1552_v14  ;;  %432 = vmatpush.msra.mxu0 %v1523_v7 }
  0x1e   :  { %563 = vmatpush.msrb.mxu3 %v1494_v0  ;;  %470 = vmatpush.msra.mxu2 %v1576_v19 }
  0x1f   :  { %451 = vmatpush.msra.mxu1 %v1568_v17  ;;  %583 = vmatpush.msrb.mxu0 %v1543_v12 }
  0x20   :  { %564 = vmatpush.msrb.mxu3 %v1502_v2  ;;  %471 = vmatpush.msra.mxu2 %v1587_v21 }
  0x21   :  { %452 = vmatpush.msra.mxu1 %v1592_v22  ;;  %584 = vmatpush.msrb.mxu0 %v1552_v14 }
  0x22   :  { %565 = vmatpush.msrb.mxu3 %v1511_v4  ;;  %472 = vmatpush.msra.mxu2 %v1610_v26 }
  0x23   :  { %585 = vmatpush.msrb.mxu0 %v1568_v17 }
  0x24   :  { %566 = vmatpush.msrb.mxu3 %v1523_v7 }
  0x25   :  { %586 = vmatpush.msrb.mxu0 %v1592_v22 }
  0x87   :  { %v61_v29 = vpop.f32.mrf.mxu0 }
  0x88   :  { %v62_v30 = vadd.f32 %v1309_v27, %v61_v29 }
  0x8a   :  { %v1660_v31 = vadd.f32 %v1310_v28, %v62_v30  ;;  %v100_v33 = vpop.f32.mrf.mxu1 }
  0x8b   :  { %v101_v36 = vadd.f32 %v1311_v32, %v100_v33 }
  0x8c   :  { %v183_v34 = vpop.f32.mrf.mxu3 }
  0x8d   :  { %v229_v35 = vadd.f32 %v183_v34, %v1660_v31  ;;  %v1669_v41 = vadd.f32 %v1312_v37, %v101_v36 }
  0x8f   :  { %v64_v38 = vpop.f32.mrf.mxu0  ;;  %v1268_v39 = vmul.f32 -1.442695, %v229_v35 }
  0x90   :  { %v65_v40 = vadd.f32 %v1309_v27, %v64_v38 }
  0x91   :  { %1315 = vpow2.f32 %v1268_v39 }
  0x92   :  { %v1671_v42 = vadd.f32 %v1310_v28, %v65_v40  ;;  %v103_v48 = vpop.f32.mrf.mxu1 }
  0x93   :  { %v104_v50 = vadd.f32 %v1311_v32, %v103_v48 }
  0x94   :  { %v203_v43 = vpop.f32.mrf.mxu3 }
  0x95   :  { %v249_v44 = vadd.f32 %v203_v43, %v1669_v41  ;;  %v1674_v54 = vadd.f32 %v1312_v37, %v104_v50 }
  0x96   :  { %v140_v62 = vpop.f32.mrf.mxu2 }
  0x97   :  { %v1316_v45 = vpop.eup %1315  ;;  %v1269_v46 = vmul.f32 -1.442695, %v249_v44  ;;  %v226_v57 = vpop.f32.mrf.mxu0  ;;  %v1688_v9 = vadd.f32 %v1684_v61, %v140_v62 }
  0x98   :  { %v233_v47 = vadd.f32 1.0, %v1316_v45  ;;  %v227_v63 = vadd.f32 %v1679_v55, %v226_v57 }
  0x99   :  { %1317 = vpow2.f32 %v1269_v46 }
  0x9a   :  { %1319 = vrcp.f32 %v233_v47  ;;  %v245_v58 = vand.u32 2147483648, %v233_v47  ;;  %v243_v60 = vand.u32 2147483647, %v233_v47  ;;  %vm239_vm2 = vweird.f32 %v233_v47 }
  0x9c   :  { %v246_v5 = vor.u32 1.1754944e-38, %v245_v58  ;;  %vm244_vm4 = vcmp.eq.f32.partialorder %v243_v60, 8.507059e+37 }
  0x9f   :  { %v1318_v49 = vpop.eup %1317 }
  0xa0   :  { %v1320_v51 = vpop.eup %1319  ;;  %v253_v52 = vadd.f32 1.0, %v1318_v49 }
  0xa1   :  { %v235_v53 = vmul.f32 %v1320_v51, %v233_v47  ;;  %vm240_vm1 = vweird.f32 %v1320_v51 }
  0xa2   :  { %1321 = vrcp.f32 %v253_v52  ;;  %vm241_vm3 = vmor %vm239_vm2, %vm240_vm1  ;;  %v265_v24 = vand.u32 2147483648, %v253_v52  ;;  %vm259_vm6 = vweird.f32 %v253_v52  ;;  %v263_v25 = vand.u32 2147483647, %v253_v52 }
  0xa3   :  { %v236_v56 = vsub.f32 1.0, %v235_v53 }
  0xa4   :  { %v266_v29 = vor.u32 1.1754944e-38, %v265_v24  ;;  %vm264_vm8 = vcmp.eq.f32.partialorder %v263_v25, 8.507059e+37 }
  0xa5   :  { %v237_v59 = vmul.f32 %v1320_v51, %v236_v56 }
  0xa7   :  { %v238_v1 = vadd.f32 %v1320_v51, %v237_v59 }
  0xa8   :  { %v1322_v3 = vpop.eup %1321 }
  0xa9   :  { %v255_v6 = vmul.f32 %v1322_v3, %v253_v52  ;;  %v242_v8 = vsel %vm241_vm3, %v1320_v51, %v238_v1  ;;  %vm260_vm5 = vweird.f32 %v1322_v3 }
  0xaa   :  { %v247_v11 = vsel %vm244_vm4, %v246_v5, %v242_v8  ;;  %vm261_vm7 = vmor %vm259_vm6, %vm260_vm5 }
  0xab   :  { %v256_v13 = vsub.f32 1.0, %v255_v6  ;;  %v269_v16 = vmul.f32 %v247_v11, %v227_v63 }
  0xad   :  { %v257_v18 = vmul.f32 %v1322_v3, %v256_v13  ;;  %v270_v20 = vadd.f32 %v269_v16, %v1688_v9 }
  0xaf   :  { %1323 = vtanh.f32 %v270_v20  ;;  %v258_v23 = vadd.f32 %v1322_v3, %v257_v18 }
  0xb1   :  { %v262_v27 = vsel %vm261_vm7, %v1322_v3, %v258_v23 }
  0xb2   :  { %v267_v32 = vsel %vm264_vm8, %v266_v29, %v262_v27 }
  0xb5   :  { %v1324_v28 = vpop.eup %1323 }
  0xb6   :  { %v272_v30 = vsub.f32 %v1535_v10, %v1324_v28  ;;  %v1716_v10 = vpop.f32.mrf.mxu2 }
  0xb8   :  { %v273_v33 = vmul.f32 %v272_v30, %v267_v32 }
  0xba   :  { %v1692_v34 = vadd.f32 %v1324_v28, %v273_v33 }
  0xbc   :  { %v276_v35 = vrot.slane %v1692_v34, 1  ;;  %279 = vst.msk [vmem:[#allocation2] sm:$0x1] %vm278_vm9, %v1692_v34  ;;  %1270 = vmatmul.msk.f32.vlgmr.msrb.gmra.mxu1 %vm37_vm0, %v1692_v34  ;;  %1271 = vmatmul.msk.f32.vlgmr.msrb.gmra.mxu2 %vm37_vm0, %v1692_v34 }
  0xbd   :  { %1272 = vmatmul.msk.f32.vlgmr.msra.gmra.mxu3 %vm37_vm0, %v1692_v34  ;;  %603 = vmatpush.msrb.mxu1 %v1557_v15 }
  0xbe   :  { %280 = vst.msk [vmem:[#allocation2 + $0x8] sm:$0x1] %vm278_vm9, %v276_v35  ;;  %697 = vmatpush.msrb.mxu2 %v1494_v0  ;;  %717 = vmatpush.msra.mxu3 %v1543_v12 }
  0xbf   :  { %604 = vmatpush.msrb.mxu1 %v1576_v19 }
  0xc0   :  { %698 = vmatpush.msrb.mxu2 %v1502_v2  ;;  %718 = vmatpush.msra.mxu3 %v1552_v14 }
  0xc1   :  { %605 = vmatpush.msrb.mxu1 %v1587_v21 }
  0xc2   :  { %699 = vmatpush.msrb.mxu2 %v1511_v4  ;;  %719 = vmatpush.msra.mxu3 %v1568_v17 }
  0xc3   :  { %606 = vmatpush.msrb.mxu1 %v1610_v26 }
  0xc4   :  { %700 = vmatpush.msrb.mxu2 %v1523_v7  ;;  %720 = vmatpush.msra.mxu3 %v1592_v22 }
 0x139   :  { %v300_v36 = vpop.f32.mrf.mxu1 }
 0x13a   :  { %v344_v37 = vrot.slane %v300_v36, 6 }
 0x13c   :  { %v346_v38 = vadd.f32 %v344_v37, %v1660_v31 }
 0x13e   :  { %v1273_v39 = vmul.f32 -1.442695, %v346_v38 }
 0x13f   :  { %v320_v40 = vpop.f32.mrf.mxu2 }
 0x140   :  { %1325 = vpow2.f32 %v1273_v39  ;;  %v367_v43 = vrot.slane %v320_v40, 6  ;;  %v340_v52 = vpop.f32.mrf.mxu3 }
 0x141   :  { %v341_v57 = vadd.f32 %v1679_v55, %v340_v52 }
 0x142   :  { %v369_v44 = vadd.f32 %v367_v43, %v1669_v41 }
 0x143   :  { %v390_v5 = vrot.slane %v341_v57, 6 }
 0x144   :  { %v1274_v45 = vmul.f32 -1.442695, %v369_v44 }
 0x146   :  { %v1326_v46 = vpop.eup %1325  ;;  %1327 = vpow2.f32 %v1274_v45 }
 0x147   :  { %v350_v47 = vadd.f32 1.0, %v1326_v46 }
 0x149   :  { %1329 = vrcp.f32 %v350_v47  ;;  %v362_v56 = vand.u32 2147483648, %v350_v47  ;;  %v360_v59 = vand.u32 2147483647, %v350_v47  ;;  %vm356_vm11 = vweird.f32 %v350_v47 }
 0x14b   :  { %v363_v1 = vor.u32 1.1754944e-38, %v362_v56  ;;  %vm361_vm13 = vcmp.eq.f32.partialorder %v360_v59, 8.507059e+37 }
 0x14c   :  { %v1328_v48 = vpop.eup %1327 }
 0x14d   :  { %v373_v49 = vadd.f32 1.0, %v1328_v48 }
 0x14f   :  { %v1330_v50 = vpop.eup %1329  ;;  %1331 = vrcp.f32 %v373_v49  ;;  %v385_v23 = vand.u32 2147483648, %v373_v49  ;;  %vm379_vm15 = vweird.f32 %v373_v49  ;;  %v383_v24 = vand.u32 2147483647, %v373_v49 }
 0x150   :  { %v352_v51 = vmul.f32 %v1330_v50, %v350_v47  ;;  %vm357_vm10 = vweird.f32 %v1330_v50 }
 0x151   :  { %vm358_vm12 = vmor %vm356_vm11, %vm357_vm10  ;;  %v386_v29 = vor.u32 1.1754944e-38, %v385_v23  ;;  %vm384_vm2 = vcmp.eq.f32.partialorder %v383_v24, 8.507059e+37 }
 0x152   :  { %v353_v53 = vsub.f32 1.0, %v352_v51 }
 0x154   :  { %v354_v58 = vmul.f32 %v1330_v50, %v353_v53 }
 0x155   :  { %v1332_v60 = vpop.eup %1331 }
 0x156   :  { %v355_v62 = vadd.f32 %v1330_v50, %v354_v58  ;;  %v375_v63 = vmul.f32 %v1332_v60, %v373_v49  ;;  %vm380_vm14 = vweird.f32 %v1332_v60 }
 0x157   :  { %vm381_vm1 = vmor %vm379_vm15, %vm380_vm14 }
 0x158   :  { %v359_v3 = vsel %vm358_vm12, %v1330_v50, %v355_v62  ;;  %v376_v11 = vsub.f32 1.0, %v375_v63 }
 0x159   :  { %v364_v6 = vsel %vm361_vm13, %v363_v1, %v359_v3 }
 0x15a   :  { %v392_v8 = vmul.f32 %v390_v5, %v364_v6  ;;  %v377_v16 = vmul.f32 %v1332_v60, %v376_v11 }
 0x15c   :  { %v393_v13 = vadd.f32 %v392_v8, %v1688_v9  ;;  %v378_v18 = vadd.f32 %v1332_v60, %v377_v16 }
 0x15e   :  { %1333 = vtanh.f32 %v393_v13  ;;  %v382_v27 = vsel %vm381_vm1, %v1332_v60, %v378_v18 }
 0x15f   :  { %v387_v32 = vsel %vm384_vm2, %v386_v29, %v382_v27 }
 0x164   :  { %v1334_v20 = vpop.eup %1333 }
 0x165   :  { %v396_v25 = vrot.slane %v1334_v20, 2 }
 0x167   :  { %v398_v28 = vsub.f32 %v1692_v34, %v396_v25 }
 0x169   :  { %v400_v30 = vrot.slane %v398_v28, 6 }
 0x16b   :  { %v402_v33 = vmul.f32 %v400_v30, %v387_v32 }
 0x16d   :  { %v1723_v35 = vadd.f32 %v1334_v20, %v402_v33 }
 0x16f   :  { %405 = vst [vmem:[#allocation1] sm:$0xff] %v1723_v35  ;;  %v414_v36 = vrot.slane %v1723_v35, 2 }
 0x171   :  { %1275 = vmatmul.msk.f32.vlgmr.msra.gmra.mxu0 %vm37_vm0, %v414_v36  ;;  %1276 = vmatmul.msk.f32.vlgmr.msra.gmra.mxu1 %vm37_vm0, %v414_v36 }
 0x172   :  { %1277 = vmatmul.msk.f32.vlgmr.msra.gmra.mxu2 %vm37_vm0, %v414_v36  ;;  %737 = vmatpush.msra.mxu0 %v1557_v15 }
 0x173   :  { %816 = vmatpush.msra.mxu1 %v1494_v0  ;;  %836 = vmatpush.msra.mxu2 %v1543_v12 }
 0x174   :  { %738 = vmatpush.msra.mxu0 %v1576_v19 }
 0x175   :  { %817 = vmatpush.msra.mxu1 %v1502_v2  ;;  %837 = vmatpush.msra.mxu2 %v1552_v14 }
 0x176   :  { %v407_v34 = vld [vmem:[#allocation1 + $0x2] ss:$9 sm:$0xff]  ;;  %739 = vmatpush.msra.mxu0 %v1587_v21 }
 0x177   :  { %v409_v37 = vld [vmem:[#allocation1 + $0x3] ss:$9 sm:$0xff]  ;;  %412 = vst.msk [vmem:[#allocation2 + $0x1] sm:$0x1] %vm278_vm9, %v407_v34  ;;  %818 = vmatpush.msra.mxu1 %v1511_v4  ;;  %838 = vmatpush.msra.mxu2 %v1568_v17 }
 0x178   :  { %413 = vst.msk [vmem:[#allocation2 + $0x9] sm:$0x1] %vm278_vm9, %v409_v37  ;;  %740 = vmatpush.msra.mxu0 %v1610_v26 }
 0x179   :  { %819 = vmatpush.msra.mxu1 %v1523_v7  ;;  %839 = vmatpush.msra.mxu2 %v1592_v22 }
 0x1ee   :  { %v434_v38 = vpop.f32.mrf.mxu0  ;;  %v454_v39 = vpop.f32.mrf.mxu1 }
 0x1ef   :  { %v478_v40 = vrot.slane %v434_v38, 4  ;;  %v501_v43 = vrot.slane %v454_v39, 4 }
 0x1f1   :  { %v480_v44 = vadd.f32 %v478_v40, %v1660_v31  ;;  %v503_v45 = vadd.f32 %v501_v43, %v1669_v41 }
 0x1f3   :  { %v1278_v46 = vmul.f32 -1.442695, %v480_v44  ;;  %v1279_v47 = vmul.f32 -1.442695, %v503_v45 }
 0x1f5   :  { %1335 = vpow2.f32 %v1278_v46  ;;  %v474_v56 = vpop.f32.mrf.mxu2 }
 0x1f6   :  { %1337 = vpow2.f32 %v1279_v47  ;;  %v475_v60 = vadd.f32 %v1679_v55, %v474_v56 }
 0x1f8   :  { %v524_v8 = vrot.slane %v475_v60, 4 }
 0x1fb   :  { %v1336_v48 = vpop.eup %1335 }
 0x1fc   :  { %v1338_v49 = vpop.eup %1337  ;;  %v484_v50 = vadd.f32 1.0, %v1336_v48 }
 0x1fd   :  { %v507_v51 = vadd.f32 1.0, %v1338_v49 }
 0x1fe   :  { %1339 = vrcp.f32 %v484_v50  ;;  %v496_v58 = vand.u32 2147483648, %v484_v50  ;;  %v494_v63 = vand.u32 2147483647, %v484_v50  ;;  %vm490_vm4 = vweird.f32 %v484_v50 }
 0x1ff   :  { %1341 = vrcp.f32 %v507_v51  ;;  %v519_v25 = vand.u32 2147483648, %v507_v51  ;;  %vm513_vm8 = vweird.f32 %v507_v51  ;;  %v517_v27 = vand.u32 2147483647, %v507_v51 }
 0x200   :  { %v497_v5 = vor.u32 1.1754944e-38, %v496_v58  ;;  %vm495_vm6 = vcmp.eq.f32.partialorder %v494_v63, 8.507059e+37 }
 0x201   :  { %v520_v32 = vor.u32 1.1754944e-38, %v519_v25  ;;  %vm518_vm11 = vcmp.eq.f32.partialorder %v517_v27, 8.507059e+37 }
 0x204   :  { %v1340_v52 = vpop.eup %1339 }
 0x205   :  { %v486_v53 = vmul.f32 %v1340_v52, %v484_v50  ;;  %v1342_v59 = vpop.eup %1341  ;;  %vm491_vm3 = vweird.f32 %v1340_v52 }
 0x206   :  { %v509_v3 = vmul.f32 %v1342_v59, %v507_v51  ;;  %vm492_vm5 = vmor %vm490_vm4, %vm491_vm3  ;;  %vm514_vm7 = vweird.f32 %v1342_v59 }
 0x207   :  { %v487_v57 = vsub.f32 1.0, %v486_v53  ;;  %vm515_vm10 = vmor %vm513_vm8, %vm514_vm7 }
 0x208   :  { %v510_v16 = vsub.f32 1.0, %v509_v3 }
 0x209   :  { %v488_v62 = vmul.f32 %v1340_v52, %v487_v57 }
 0x20a   :  { %v511_v20 = vmul.f32 %v1342_v59, %v510_v16 }
 0x20b   :  { %v489_v1 = vadd.f32 %v1340_v52, %v488_v62 }
 0x20c   :  { %v512_v23 = vadd.f32 %v1342_v59, %v511_v20 }
 0x20d   :  { %v493_v6 = vsel %vm492_vm5, %v1340_v52, %v489_v1 }
 0x20e   :  { %v498_v11 = vsel %vm495_vm6, %v497_v5, %v493_v6  ;;  %v516_v29 = vsel %vm515_vm10, %v1342_v59, %v512_v23 }
 0x20f   :  { %v526_v13 = vmul.f32 %v524_v8, %v498_v11  ;;  %v521_v36 = vsel %vm518_vm11, %v520_v32, %v516_v29 }
 0x211   :  { %v527_v18 = vadd.f32 %v526_v13, %v1688_v9 }
 0x213   :  { %1343 = vtanh.f32 %v527_v18 }
 0x219   :  { %v1344_v24 = vpop.eup %1343 }
 0x21a   :  { %v530_v28 = vrot.slane %v1344_v24, 2 }
 0x21c   :  { %v532_v30 = vsub.f32 %v1723_v35, %v530_v28 }
 0x21e   :  { %v534_v33 = vrot.slane %v532_v30, 6 }
 0x220   :  { %v536_v34 = vmul.f32 %v534_v33, %v521_v36 }
 0x222   :  { %v1749_v37 = vadd.f32 %v1344_v24, %v536_v34 }
 0x224   :  { %539 = vst [vmem:[#allocation1] sm:$0xff] %v1749_v37  ;;  %v548_v38 = vrot.slane %v1749_v37, 4 }
 0x226   :  { %1280 = vmatmul.msk.f32.vlgmr.msrb.gmra.mxu3 %vm37_vm0, %v548_v38  ;;  %1281 = vmatmul.msk.f32.vlgmr.msrb.gmra.mxu0 %vm37_vm0, %v548_v38 }
 0x227   :  { %1282 = vmatmul.msk.f32.vlgmr.msrb.gmra.mxu1 %vm37_vm0, %v548_v38  ;;  %856 = vmatpush.msrb.mxu3 %v1557_v15 }
 0x228   :  { %950 = vmatpush.msrb.mxu0 %v1494_v0  ;;  %970 = vmatpush.msrb.mxu1 %v1543_v12 }
 0x229   :  { %857 = vmatpush.msrb.mxu3 %v1576_v19 }
 0x22a   :  { %951 = vmatpush.msrb.mxu0 %v1502_v2  ;;  %971 = vmatpush.msrb.mxu1 %v1552_v14 }
 0x22b   :  { %v541_v35 = vld [vmem:[#allocation1 + $0x4] ss:$9 sm:$0xff]  ;;  %858 = vmatpush.msrb.mxu3 %v1587_v21 }
 0x22c   :  { %v543_v39 = vld [vmem:[#allocation1 + $0x5] ss:$9 sm:$0xff]  ;;  %546 = vst.msk [vmem:[#allocation2 + $0x2] sm:$0x1] %vm278_vm9, %v541_v35  ;;  %952 = vmatpush.msrb.mxu0 %v1511_v4  ;;  %972 = vmatpush.msrb.mxu1 %v1568_v17 }
 0x22d   :  { %547 = vst.msk [vmem:[#allocation2 + $0xa] sm:$0x1] %vm278_vm9, %v543_v39  ;;  %859 = vmatpush.msrb.mxu3 %v1610_v26 }
 0x22e   :  { %953 = vmatpush.msrb.mxu0 %v1523_v7  ;;  %973 = vmatpush.msrb.mxu1 %v1592_v22 }
 0x2a3   :  { %v588_v40 = vpop.f32.mrf.mxu0 }
 0x2a4   :  { %v635_v43 = vrot.slane %v588_v40, 2  ;;  %v608_v58 = vpop.f32.mrf.mxu1 }
 0x2a5   :  { %v609_v62 = vadd.f32 %v1679_v55, %v608_v58 }
 0x2a6   :  { %v637_v44 = vadd.f32 %v635_v43, %v1669_v41 }
 0x2a7   :  { %v658_v6 = vrot.slane %v609_v62, 2 }
 0x2a8   :  { %v1284_v48 = vmul.f32 -1.442695, %v637_v44 }
 0x2a9   :  { %v568_v45 = vpop.f32.mrf.mxu3 }
 0x2aa   :  { %v612_v46 = vrot.slane %v568_v45, 2 }
 0x2ac   :  { %v614_v47 = vadd.f32 %v612_v46, %v1660_v31 }
 0x2ae   :  { %v1283_v49 = vmul.f32 -1.442695, %v614_v47 }
 0x2b0   :  { %1345 = vpow2.f32 %v1283_v49 }
 0x2b1   :  { %1347 = vpow2.f32 %v1284_v48 }
 0x2b6   :  { %v1346_v50 = vpop.eup %1345 }
 0x2b7   :  { %v1348_v51 = vpop.eup %1347  ;;  %v618_v52 = vadd.f32 1.0, %v1346_v50 }
 0x2b8   :  { %v641_v53 = vadd.f32 1.0, %v1348_v51 }
 0x2b9   :  { %1349 = vrcp.f32 %v618_v52  ;;  %v630_v60 = vand.u32 2147483648, %v618_v52  ;;  %v628_v31 = vand.u32 2147483647, %v618_v52  ;;  %vm624_vm13 = vweird.f32 %v618_v52 }
 0x2ba   :  { %1351 = vrcp.f32 %v641_v53  ;;  %v653_v25 = vand.u32 2147483648, %v641_v53  ;;  %vm647_vm2 = vweird.f32 %v641_v53  ;;  %v651_v27 = vand.u32 2147483647, %v641_v53 }
 0x2bb   :  { %v631_v5 = vor.u32 1.1754944e-38, %v630_v60  ;;  %vm629_vm15 = vcmp.eq.f32.partialorder %v628_v31, 8.507059e+37 }
 0x2bc   :  { %v654_v32 = vor.u32 1.1754944e-38, %v653_v25  ;;  %vm652_vm4 = vcmp.eq.f32.partialorder %v651_v27, 8.507059e+37 }
 0x2bf   :  { %v1350_v56 = vpop.eup %1349 }
 0x2c0   :  { %v620_v57 = vmul.f32 %v1350_v56, %v618_v52  ;;  %v1352_v41 = vpop.eup %1351  ;;  %vm625_vm12 = vweird.f32 %v1350_v56 }
 0x2c1   :  { %v643_v3 = vmul.f32 %v1352_v41, %v641_v53  ;;  %vm626_vm14 = vmor %vm624_vm13, %vm625_vm12  ;;  %vm648_vm1 = vweird.f32 %v1352_v41 }
 0x2c2   :  { %v621_v59 = vsub.f32 1.0, %v620_v57  ;;  %vm649_vm3 = vmor %vm647_vm2, %vm648_vm1 }
 0x2c3   :  { %v644_v16 = vsub.f32 1.0, %v643_v3 }
 0x2c4   :  { %v622_v63 = vmul.f32 %v1350_v56, %v621_v59  ;;  %v1801_v59 = vadd.f32 %v1684_v61, %v1716_v10 }
 0x2c5   :  { %v645_v20 = vmul.f32 %v1352_v41, %v644_v16 }
 0x2c6   :  { %v623_v1 = vadd.f32 %v1350_v56, %v622_v63 }
 0x2c7   :  { %v646_v23 = vadd.f32 %v1352_v41, %v645_v20 }
 0x2c8   :  { %v627_v8 = vsel %vm626_vm14, %v1350_v56, %v623_v1 }
 0x2c9   :  { %v632_v11 = vsel %vm629_vm15, %v631_v5, %v627_v8  ;;  %v650_v29 = vsel %vm649_vm3, %v1352_v41, %v646_v23 }
 0x2ca   :  { %v660_v13 = vmul.f32 %v658_v6, %v632_v11  ;;  %v655_v36 = vsel %vm652_vm4, %v654_v32, %v650_v29 }
 0x2cc   :  { %v661_v18 = vadd.f32 %v660_v13, %v1688_v9 }
 0x2ce   :  { %1353 = vtanh.f32 %v661_v18 }
 0x2d4   :  { %v1354_v24 = vpop.eup %1353 }
 0x2d5   :  { %v664_v28 = vrot.slane %v1354_v24, 2 }
 0x2d7   :  { %v666_v30 = vsub.f32 %v1749_v37, %v664_v28 }
 0x2d9   :  { %v668_v33 = vrot.slane %v666_v30, 6 }
 0x2db   :  { %v670_v34 = vmul.f32 %v668_v33, %v655_v36 }
 0x2dd   :  { %v1775_v38 = vadd.f32 %v1354_v24, %v670_v34 }
 0x2df   :  { %673 = vst [vmem:[#allocation1] sm:$0xff] %v1775_v38  ;;  %v682_v9 = vrot.slane %v1775_v38, 6 }
 0x2e1   :  { %1285 = vmatmul.msk.f32.vlgmr.msrb.gmra.mxu2 %vm37_vm0, %v682_v9  ;;  %1286 = vmatmul.msk.f32.vlgmr.msra.gmra.mxu3 %vm37_vm0, %v682_v9 }
 0x2e2   :  { %1287 = vmatmul.msk.f32.vlgmr.msra.gmra.mxu0 %vm37_vm0, %v682_v9  ;;  %990 = vmatpush.msrb.mxu2 %v1557_v15 }
 0x2e3   :  { %1084 = vmatpush.msra.mxu3 %v1494_v0  ;;  %1104 = vmatpush.msra.mxu0 %v1543_v12 }
 0x2e4   :  { %991 = vmatpush.msrb.mxu2 %v1576_v19 }
 0x2e5   :  { %1085 = vmatpush.msra.mxu3 %v1502_v2  ;;  %1105 = vmatpush.msra.mxu0 %v1552_v14 }
 0x2e6   :  { %v675_v37 = vld [vmem:[#allocation1 + $0x6] ss:$9 sm:$0xff]  ;;  %992 = vmatpush.msrb.mxu2 %v1587_v21 }
 0x2e7   :  { %v677_v35 = vld [vmem:[#allocation1 + $0x7] ss:$9 sm:$0xff]  ;;  %680 = vst.msk [vmem:[#allocation2 + $0x3] sm:$0x1] %vm278_vm9, %v675_v37  ;;  %1086 = vmatpush.msra.mxu3 %v1511_v4  ;;  %1106 = vmatpush.msra.mxu0 %v1568_v17 }
 0x2e8   :  { %681 = vst.msk [vmem:[#allocation2 + $0xb] sm:$0x1] %vm278_vm9, %v677_v35  ;;  %993 = vmatpush.msrb.mxu2 %v1610_v26 }
 0x2e9   :  { %1087 = vmatpush.msra.mxu3 %v1523_v7  ;;  %1107 = vmatpush.msra.mxu0 %v1592_v22 }
 0x35f   :  { %v742_v50 = vpop.f32.mrf.mxu0 }
 0x360   :  { %v743_v56 = vadd.f32 %v1679_v55, %v742_v50 }
 0x364   :  { %v702_v0 = vpop.f32.mrf.mxu2  ;;  %v722_v2 = vpop.f32.mrf.mxu3 }
 0x365   :  { %v745_v12 = vadd.f32 %v702_v0, %v1671_v42  ;;  %v765_v14 = vadd.f32 %v722_v2, %v1674_v54 }
 0x367   :  { %v1288_v39 = vmul.f32 -1.442695, %v745_v12  ;;  %v1289_v40 = vmul.f32 -1.442695, %v765_v14 }
 0x369   :  { %1355 = vpow2.f32 %v1288_v39 }
 0x36a   :  { %1357 = vpow2.f32 %v1289_v40 }
 0x36f   :  { %v1356_v4 = vpop.eup %1355 }
 0x370   :  { %v1358_v17 = vpop.eup %1357  ;;  %v749_v43 = vadd.f32 1.0, %v1356_v4 }
 0x371   :  { %v769_v44 = vadd.f32 1.0, %v1358_v17 }
 0x372   :  { %1359 = vrcp.f32 %v749_v43  ;;  %v761_v22 = vand.u32 2147483648, %v749_v43  ;;  %v759_v49 = vand.u32 2147483647, %v749_v43  ;;  %vm755_vm6 = vweird.f32 %v749_v43 }
 0x373   :  { %1361 = vrcp.f32 %v769_v44  ;;  %v781_v3 = vand.u32 2147483648, %v769_v44  ;;  %vm775_vm11 = vweird.f32 %v769_v44  ;;  %v779_v5 = vand.u32 2147483647, %v769_v44 }
 0x374   :  { %v762_v52 = vor.u32 1.1754944e-38, %v761_v22  ;;  %vm760_vm8 = vcmp.eq.f32.partialorder %v759_v49, 8.507059e+37 }
 0x375   :  { %v782_v13 = vor.u32 1.1754944e-38, %v781_v3  ;;  %vm780_vm13 = vcmp.eq.f32.partialorder %v779_v5, 8.507059e+37 }
 0x378   :  { %v1360_v45 = vpop.eup %1359 }
 0x379   :  { %v751_v7 = vmul.f32 %v1360_v45, %v749_v43  ;;  %v1362_v47 = vpop.eup %1361  ;;  %vm756_vm5 = vweird.f32 %v1360_v45 }
 0x37a   :  { %vm757_vm7 = vmor %vm755_vm6, %vm756_vm5  ;;  %v771_v53 = vmul.f32 %v1362_v47, %v769_v44  ;;  %vm776_vm10 = vweird.f32 %v1362_v47 }
 0x37b   :  { %v752_v46 = vsub.f32 1.0, %v751_v7  ;;  %vm777_vm12 = vmor %vm775_vm11, %vm776_vm10 }
 0x37c   :  { %v772_v41 = vsub.f32 1.0, %v771_v53 }
 0x37d   :  { %v753_v48 = vmul.f32 %v1360_v45, %v752_v46 }
 0x37e   :  { %v773_v63 = vmul.f32 %v1362_v47, %v772_v41 }
 0x37f   :  { %v754_v51 = vadd.f32 %v1360_v45, %v753_v48 }
 0x380   :  { %v774_v31 = vadd.f32 %v1362_v47, %v773_v63 }
 0x381   :  { %v758_v57 = vsel %vm757_vm7, %v1360_v45, %v754_v51 }
 0x382   :  { %v763_v58 = vsel %vm760_vm8, %v762_v52, %v758_v57  ;;  %v778_v8 = vsel %vm777_vm12, %v1362_v47, %v774_v31 }
 0x383   :  { %v785_v60 = vmul.f32 %v763_v58, %v743_v56  ;;  %v783_v10 = vsel %vm780_vm13, %v782_v13, %v778_v8 }
 0x385   :  { %v786_v62 = vadd.f32 %v785_v60, %v1801_v59 }
 0x387   :  { %1363 = vtanh.f32 %v786_v62 }
 0x38d   :  { %v1364_v1 = vpop.eup %1363 }
 0x38e   :  { %v789_v6 = vrot.slane %v1364_v1, 2 }
 0x390   :  { %v791_v11 = vsub.f32 %v1775_v38, %v789_v6 }
 0x392   :  { %v793_v61 = vrot.slane %v791_v11, 6 }
 0x394   :  { %v795_v16 = vmul.f32 %v793_v61, %v783_v10 }
 0x396   :  { %v796_v18 = vadd.f32 %v1364_v1, %v795_v16 }
 0x398   :  { %v798_v20 = vrot.slane %v796_v18, 1  ;;  %800 = vst.msk [vmem:[#allocation2 + $0x4] sm:$0x1] %vm278_vm9, %v796_v18  ;;  %1290 = vmatmul.msk.f32.vlgmr.msra.gmra.mxu1 %vm37_vm0, %v796_v18  ;;  %1291 = vmatmul.msk.f32.vlgmr.msra.gmra.mxu2 %vm37_vm0, %v796_v18 }
 0x399   :  { %1292 = vmatmul.msk.f32.vlgmr.msrb.gmra.mxu3 %vm37_vm0, %v796_v18  ;;  %1124 = vmatpush.msra.mxu1 %v1557_v15 }
 0x39a   :  { %801 = vst.msk [vmem:[#allocation2 + $0xc] sm:$0x1] %vm278_vm9, %v798_v20 }
 0x39b   :  { %1125 = vmatpush.msra.mxu1 %v1576_v19 }
 0x39d   :  { %1126 = vmatpush.msra.mxu1 %v1587_v21 }
 0x39f   :  { %1127 = vmatpush.msra.mxu1 %v1610_v26 }
 0x415   :  { %v821_v23 = vpop.f32.mrf.mxu1 }
 0x416   :  { %v865_v24 = vrot.slane %v821_v23, 6 }
 0x418   :  { %v867_v25 = vadd.f32 %v865_v24, %v1671_v42 }
 0x41a   :  { %v1293_v27 = vmul.f32 -1.442695, %v867_v25 }
 0x41b   :  { %v841_v28 = vpop.f32.mrf.mxu2 }
 0x41c   :  { %1365 = vpow2.f32 %v1293_v27  ;;  %v888_v29 = vrot.slane %v841_v28, 6  ;;  %v861_v34 = vpop.f32.mrf.mxu3 }
 0x41d   :  { %v862_v37 = vadd.f32 %v1679_v55, %v861_v34 }
 0x41e   :  { %v890_v30 = vadd.f32 %v888_v29, %v1674_v54 }
 0x41f   :  { %v911_v4 = vrot.slane %v862_v37, 6 }
 0x420   :  { %v1294_v32 = vmul.f32 -1.442695, %v890_v30 }
 0x422   :  { %v1366_v15 = vpop.eup %1365  ;;  %1367 = vpow2.f32 %v1294_v32 }
 0x423   :  { %v871_v33 = vadd.f32 1.0, %v1366_v15 }
 0x425   :  { %1369 = vrcp.f32 %v871_v33  ;;  %v883_v9 = vand.u32 2147483648, %v871_v33  ;;  %v881_v0 = vand.u32 2147483647, %v871_v33  ;;  %vm877_vm15 = vweird.f32 %v871_v33 }
 0x427   :  { %v884_v39 = vor.u32 1.1754944e-38, %v883_v9  ;;  %vm882_vm2 = vcmp.eq.f32.partialorder %v881_v0, 8.507059e+37 }
 0x428   :  { %v1368_v19 = vpop.eup %1367 }
 0x429   :  { %v894_v36 = vadd.f32 1.0, %v1368_v19 }
 0x42b   :  { %v1370_v21 = vpop.eup %1369  ;;  %1371 = vrcp.f32 %v894_v36  ;;  %v906_v47 = vand.u32 2147483648, %v894_v36  ;;  %vm900_vm4 = vweird.f32 %v894_v36  ;;  %v904_v48 = vand.u32 2147483647, %v894_v36 }
 0x42c   :  { %v873_v26 = vmul.f32 %v1370_v21, %v871_v33  ;;  %vm878_vm14 = vweird.f32 %v1370_v21 }
 0x42d   :  { %vm879_vm1 = vmor %vm877_vm15, %vm878_vm14  ;;  %v907_v52 = vor.u32 1.1754944e-38, %v906_v47  ;;  %vm905_vm6 = vcmp.eq.f32.partialorder %v904_v48, 8.507059e+37 }
 0x42e   :  { %v874_v38 = vsub.f32 1.0, %v873_v26 }
 0x430   :  { %v875_v35 = vmul.f32 %v1370_v21, %v874_v38 }
 0x431   :  { %v1372_v2 = vpop.eup %1371 }
 0x432   :  { %v876_v12 = vadd.f32 %v1370_v21, %v875_v35  ;;  %v896_v14 = vmul.f32 %v1372_v2, %v894_v36  ;;  %vm901_vm3 = vweird.f32 %v1372_v2 }
 0x433   :  { %vm902_vm5 = vmor %vm900_vm4, %vm901_vm3 }
 0x434   :  { %v880_v40 = vsel %vm879_vm1, %v1370_v21, %v876_v12  ;;  %v897_v44 = vsub.f32 1.0, %v896_v14 }
 0x435   :  { %v885_v17 = vsel %vm882_vm2, %v884_v39, %v880_v40 }
 0x436   :  { %v913_v43 = vmul.f32 %v911_v4, %v885_v17  ;;  %v898_v7 = vmul.f32 %v1372_v2, %v897_v44 }
 0x438   :  { %v914_v45 = vadd.f32 %v913_v43, %v1801_v59  ;;  %v899_v46 = vadd.f32 %v1372_v2, %v898_v7 }
 0x43a   :  { %1373 = vtanh.f32 %v914_v45  ;;  %v903_v50 = vsel %vm902_vm5, %v1372_v2, %v899_v46 }
 0x43b   :  { %v908_v56 = vsel %vm905_vm6, %v907_v52, %v903_v50 }
 0x440   :  { %v1374_v22 = vpop.eup %1373 }
 0x441   :  { %v917_v49 = vrot.slane %v1374_v22, 2 }
 0x443   :  { %v919_v51 = vsub.f32 %v796_v18, %v917_v49 }
 0x445   :  { %v921_v53 = vrot.slane %v919_v51, 6 }
 0x447   :  { %v923_v57 = vmul.f32 %v921_v53, %v908_v56 }
 0x449   :  { %v924_v58 = vadd.f32 %v1374_v22, %v923_v57 }
 0x44b   :  { %926 = vst [vmem:[#allocation1] sm:$0xff] %v924_v58  ;;  %v935_v60 = vrot.slane %v924_v58, 2 }
 0x44d   :  { %1295 = vmatmul.msk.f32.vlgmr.msrb.gmra.mxu0 %vm37_vm0, %v935_v60  ;;  %1296 = vmatmul.msk.f32.vlgmr.msrb.gmra.mxu1 %vm37_vm0, %v935_v60 }
 0x44e   :  { %1297 = vmatmul.msk.f32.vlgmr.msrb.gmra.mxu2 %vm37_vm0, %v935_v60 }
 0x452   :  { %v928_v41 = vld [vmem:[#allocation1 + $0x2] ss:$9 sm:$0xff] }
 0x453   :  { %v930_v62 = vld [vmem:[#allocation1 + $0x3] ss:$9 sm:$0xff]  ;;  %933 = vst.msk [vmem:[#allocation2 + $0x5] sm:$0x1] %vm278_vm9, %v928_v41 }
 0x454   :  { %934 = vst.msk [vmem:[#allocation2 + $0xd] sm:$0x1] %vm278_vm9, %v930_v62 }
 0x4ca   :  { %v955_v63 = vpop.f32.mrf.mxu0  ;;  %v975_v31 = vpop.f32.mrf.mxu1 }
 0x4cb   :  { %v999_v1 = vrot.slane %v955_v63, 4  ;;  %v1022_v3 = vrot.slane %v975_v31, 4 }
 0x4cd   :  { %v1001_v5 = vadd.f32 %v999_v1, %v1671_v42  ;;  %v1024_v6 = vadd.f32 %v1022_v3, %v1674_v54 }
 0x4cf   :  { %v1298_v8 = vmul.f32 -1.442695, %v1001_v5  ;;  %v1299_v11 = vmul.f32 -1.442695, %v1024_v6 }
 0x4d1   :  { %1375 = vpow2.f32 %v1298_v8  ;;  %v995_v23 = vpop.f32.mrf.mxu2 }
 0x4d2   :  { %1377 = vpow2.f32 %v1299_v11  ;;  %v996_v28 = vadd.f32 %v1679_v55, %v995_v23 }
 0x4d4   :  { %v1045_v36 = vrot.slane %v996_v28, 4 }
 0x4d7   :  { %v1376_v13 = vpop.eup %1375 }
 0x4d8   :  { %v1378_v61 = vpop.eup %1377  ;;  %v1005_v10 = vadd.f32 1.0, %v1376_v13 }
 0x4d9   :  { %v1028_v16 = vadd.f32 1.0, %v1378_v61 }
 0x4da   :  { %1379 = vrcp.f32 %v1005_v10  ;;  %v1017_v25 = vand.u32 2147483648, %v1005_v10  ;;  %v1015_v30 = vand.u32 2147483647, %v1005_v10  ;;  %vm1011_vm8 = vweird.f32 %v1005_v10 }
 0x4db   :  { %1381 = vrcp.f32 %v1028_v16  ;;  %v1040_v0 = vand.u32 2147483648, %v1028_v16  ;;  %vm1034_vm13 = vweird.f32 %v1028_v16  ;;  %v1038_v2 = vand.u32 2147483647, %v1028_v16 }
 0x4dc   :  { %v1018_v33 = vor.u32 1.1754944e-38, %v1017_v25  ;;  %vm1016_vm11 = vcmp.eq.f32.partialorder %v1015_v30, 8.507059e+37 }
 0x4dd   :  { %v1041_v40 = vor.u32 1.1754944e-38, %v1040_v0  ;;  %vm1039_vm15 = vcmp.eq.f32.partialorder %v1038_v2, 8.507059e+37 }
 0x4e0   :  { %v1380_v18 = vpop.eup %1379 }
 0x4e1   :  { %v1007_v20 = vmul.f32 %v1380_v18, %v1005_v10  ;;  %v1382_v27 = vpop.eup %1381  ;;  %vm1012_vm7 = vweird.f32 %v1380_v18 }
 0x4e2   :  { %v1030_v15 = vmul.f32 %v1382_v27, %v1028_v16  ;;  %vm1013_vm10 = vmor %vm1011_vm8, %vm1012_vm7  ;;  %vm1035_vm12 = vweird.f32 %v1382_v27  ;;  %vm1203_vm8 = vcmask 261126  }
 0x4e3   :  { %v1008_v24 = vsub.f32 1.0, %v1007_v20  ;;  %vm1036_vm14 = vmor %vm1034_vm13, %vm1035_vm12 }
 0x4e4   :  { %v1031_v34 = vsub.f32 1.0, %v1030_v15 }
 0x4e5   :  { %v1009_v29 = vmul.f32 %v1380_v18, %v1008_v24 }
 0x4e6   :  { %v1032_v9 = vmul.f32 %v1382_v27, %v1031_v34 }
 0x4e7   :  { %v1010_v32 = vadd.f32 %v1380_v18, %v1009_v29 }
 0x4e8   :  { %v1033_v37 = vadd.f32 %v1382_v27, %v1032_v9 }
 0x4e9   :  { %v1014_v19 = vsel %vm1013_vm10, %v1380_v18, %v1010_v32 }
 0x4ea   :  { %v1019_v21 = vsel %vm1016_vm11, %v1018_v33, %v1014_v19  ;;  %v1037_v14 = vsel %vm1036_vm14, %v1382_v27, %v1033_v37 }
 0x4eb   :  { %v1047_v26 = vmul.f32 %v1045_v36, %v1019_v21  ;;  %v1042_v17 = vsel %vm1039_vm15, %v1041_v40, %v1037_v14 }
 0x4ed   :  { %v1048_v38 = vadd.f32 %v1047_v26, %v1801_v59 }
 0x4ef   :  { %1383 = vtanh.f32 %v1048_v38 }
 0x4f5   :  { %v1384_v35 = vpop.eup %1383 }
 0x4f6   :  { %v1051_v12 = vrot.slane %v1384_v35, 2 }
 0x4f8   :  { %v1053_v39 = vsub.f32 %v924_v58, %v1051_v12 }
 0x4fa   :  { %v1055_v4 = vrot.slane %v1053_v39, 6 }
 0x4fc   :  { %v1057_v43 = vmul.f32 %v1055_v4, %v1042_v17 }
 0x4fe   :  { %v1058_v44 = vadd.f32 %v1384_v35, %v1057_v43 }
 0x500   :  { %1060 = vst [vmem:[#allocation1] sm:$0xff] %v1058_v44  ;;  %v1069_v45 = vrot.slane %v1058_v44, 4 }
 0x502   :  { %1300 = vmatmul.msk.f32.vlgmr.msra.gmra.mxu3 %vm37_vm0, %v1069_v45  ;;  %1301 = vmatmul.msk.f32.vlgmr.msra.gmra.mxu0 %vm37_vm0, %v1069_v45 }
 0x503   :  { %1302 = vmatmul.msk.f32.vlgmr.msra.gmra.mxu1 %vm37_vm0, %v1069_v45 }
 0x507   :  { %v1062_v7 = vld [vmem:[#allocation1 + $0x4] ss:$9 sm:$0xff] }
 0x508   :  { %v1064_v46 = vld [vmem:[#allocation1 + $0x5] ss:$9 sm:$0xff]  ;;  %1067 = vst.msk [vmem:[#allocation2 + $0x6] sm:$0x1] %vm278_vm9, %v1062_v7 }
 0x509   :  { %1068 = vst.msk [vmem:[#allocation2 + $0xe] sm:$0x1] %vm278_vm9, %v1064_v46 }
 0x57f   :  { %v1109_v22 = vpop.f32.mrf.mxu0 }
 0x580   :  { %v1156_v47 = vrot.slane %v1109_v22, 2  ;;  %v1129_v63 = vpop.f32.mrf.mxu1 }
 0x581   :  { %v1130_v3 = vadd.f32 %v1679_v55, %v1129_v63 }
 0x582   :  { %v1158_v48 = vadd.f32 %v1156_v47, %v1674_v54 }
 0x583   :  { %v1179_v13 = vrot.slane %v1130_v3, 2 }
 0x584   :  { %v1304_v52 = vmul.f32 -1.442695, %v1158_v48 }
 0x585   :  { %v1089_v49 = vpop.f32.mrf.mxu3 }
 0x586   :  { %v1133_v50 = vrot.slane %v1089_v49, 2 }
 0x588   :  { %v1135_v51 = vadd.f32 %v1133_v50, %v1671_v42 }
 0x58a   :  { %v1303_v53 = vmul.f32 -1.442695, %v1135_v51 }
 0x58c   :  { %1385 = vpow2.f32 %v1303_v53 }
 0x58d   :  { %1387 = vpow2.f32 %v1304_v52 }
 0x592   :  { %v1386_v56 = vpop.eup %1385 }
 0x593   :  { %v1388_v57 = vpop.eup %1387  ;;  %v1139_v58 = vadd.f32 1.0, %v1386_v56 }
 0x594   :  { %v1162_v60 = vadd.f32 1.0, %v1388_v57 }
 0x595   :  { %1389 = vrcp.f32 %v1139_v58  ;;  %v1151_v1 = vand.u32 2147483648, %v1139_v58  ;;  %v1149_v42 = vand.u32 2147483647, %v1139_v58  ;;  %vm1145_vm1 = vweird.f32 %v1139_v58 }
 0x596   :  { %1391 = vrcp.f32 %v1162_v60  ;;  %v1174_v25 = vand.u32 2147483648, %v1162_v60  ;;  %vm1168_vm5 = vweird.f32 %v1162_v60  ;;  %v1172_v27 = vand.u32 2147483647, %v1162_v60 }
 0x597   :  { %v1152_v11 = vor.u32 1.1754944e-38, %v1151_v1  ;;  %vm1150_vm3 = vcmp.eq.f32.partialorder %v1149_v42, 8.507059e+37 }
 0x598   :  { %v1175_v32 = vor.u32 1.1754944e-38, %v1174_v25  ;;  %vm1173_vm7 = vcmp.eq.f32.partialorder %v1172_v27, 8.507059e+37 }
 0x59b   :  { %v1390_v41 = vpop.eup %1389 }
 0x59c   :  { %v1141_v62 = vmul.f32 %v1390_v41, %v1139_v58  ;;  %v1392_v54 = vpop.eup %1391  ;;  %vm1146_vm0 = vweird.f32 %v1390_v41 }
 0x59d   :  { %v1164_v8 = vmul.f32 %v1392_v54, %v1162_v60  ;;  %vm1147_vm2 = vmor %vm1145_vm1, %vm1146_vm0  ;;  %vm1169_vm4 = vweird.f32 %v1392_v54 }
 0x59e   :  { %v1142_v31 = vsub.f32 1.0, %v1141_v62  ;;  %vm1170_vm6 = vmor %vm1168_vm5, %vm1169_vm4 }
 0x59f   :  { %v1165_v18 = vsub.f32 1.0, %v1164_v8 }
 0x5a0   :  { %v1143_v5 = vmul.f32 %v1390_v41, %v1142_v31 }
 0x5a1   :  { %v1166_v23 = vmul.f32 %v1392_v54, %v1165_v18 }
 0x5a2   :  { %v1144_v6 = vadd.f32 %v1390_v41, %v1143_v5 }
 0x5a3   :  { %v1167_v24 = vadd.f32 %v1392_v54, %v1166_v23 }
 0x5a4   :  { %v1148_v61 = vsel %vm1147_vm2, %v1390_v41, %v1144_v6 }
 0x5a5   :  { %v1153_v10 = vsel %vm1150_vm3, %v1152_v11, %v1148_v61  ;;  %v1171_v29 = vsel %vm1170_vm6, %v1392_v54, %v1167_v24 }
 0x5a6   :  { %v1181_v16 = vmul.f32 %v1179_v13, %v1153_v10  ;;  %v1176_v33 = vsel %vm1173_vm7, %v1175_v32, %v1171_v29 }
 0x5a8   :  { %v1182_v20 = vadd.f32 %v1181_v16, %v1801_v59 }
 0x5aa   :  { %1393 = vtanh.f32 %v1182_v20 }
 0x5b0   :  { %v1394_v55 = vpop.eup %1393 }
 0x5b1   :  { %v1185_v28 = vrot.slane %v1394_v55, 2 }
 0x5b3   :  { %v1187_v30 = vsub.f32 %v1058_v44, %v1185_v28 }
 0x5b5   :  { %v1189_v15 = vrot.slane %v1187_v30, 6 }
 0x5b7   :  { %v1191_v19 = vmul.f32 %v1189_v15, %v1176_v33 }
 0x5b9   :  { %v1192_v59 = vadd.f32 %v1394_v55, %v1191_v19 }
 0x5bb   :  { %1194 = vst [vmem:[#allocation1] sm:$0xff] %v1192_v59 }
 0x5bc   :  { %1204 = vst.msk [vmem:[#allocation4 - $0x6] sm:$0xc0] %vm1203_vm8, %v1192_v59 }
 0x5bd   :  { %1228 = dma.vmem_to_hbm [thread:$0]  %s1224_s5, 32, %s1226_s18, [#allocation5]  }
 0x5c2   :  { %v1196_v36 = vld [vmem:[#allocation1 + $0x6] ss:$9 sm:$0xff] }
 0x5c3   :  { %v1198_v21 = vld [vmem:[#allocation1 + $0x7] ss:$9 sm:$0xff]  ;;  %1201 = vst.msk [vmem:[#allocation2 + $0x7] sm:$0x1] %vm278_vm9, %v1196_v36 }
 0x5c4   :  { %1202 = vst.msk [vmem:[#allocation2 + $0xf] sm:$0x1] %vm278_vm9, %v1198_v21 }
 0x5c5   :  { %1217 = dma.vmem_to_hbm [thread:$0]  %s1210_s20, 256, %s1212_s23, [#allocation3], %s1449_s7, %s1449_s7, %s1450_s24  }
 0x5c6   :  { %1443 = dma.done.wait [#allocation3], 256  }
 0x5c7   :  { %1444 = vsyncadd [#allocation3], 4294967040 }
 0x5c8   :  { %1445 = dma.done.wait [#allocation5], 32  }
 0x5c9   :  { %1446 = vsyncadd [#allocation5], 4294967264 }
 0x5ca   :  { %1237 = vsyncpa [#allocation3], 1 }
 0x5cb   :  { %1238 = vsyncpa [#allocation5], 1 }

</bundles_post_ra>
